<compile_context>
chip_gen: v7x
topology: tpu7x:2x2x1
jax: 0.10.0
libtpu: 0.0.40
codegen_flags: <defaults>
</compile_context>

<pallas_src>
import jax
import jax.numpy as jnp
from jax import lax
from jax.experimental import pallas as pl
from jax.experimental.pallas import tpu as pltpu

# ---- shapes fixed by the PyTorch module definition ----
C0, C1, C2 = 100, 70, 140              # channels: in -> conv1 -> conv2
K = 3                                  # conv kernel size
L0 = 14                                # time: 14 -> 12 -> 6 -> 4 -> 2
L1, L1P = L0 - K + 1, (L0 - K + 1) // 2
L2, L2P = L1P - K + 1, (L1P - K + 1) // 2
H, NCLS = 800, 5
BN_EPS = 1e-5

# lane-padded widths
CP0, CP1, CP2, NP = 128, 128, 256, 128
HP = 1024                               # H=800 padded to a multiple of 256


def _round_up(x, m):
    return (x + m - 1) // m * m


# ----------------------------- kernel ---------------------------------------
def cnn_kernel(x_ref, w1_ref, t1_ref, w2_ref, t2_ref,
               wf1a_ref, wf1b_ref, bf1_ref, wf2_ref, bf2_ref, o_ref):
    x = x_ref[...]                                     # (L0, tn, CP0) bf16
    tn = x.shape[1]

    def conv_bn_relu_pool(inp, w, t, l_out, c_in, c_out):
        # im2col: lane-concat the K shifted views -> ONE K*c_in-deep matmul.
        a = jnp.concatenate([inp[k:k + l_out] for k in range(K)], axis=-1)
        a = a.reshape(l_out * tn, K * c_in)            # (l_out*tn, K*c_in) bf16
        acc = jnp.dot(a, w, preferred_element_type=jnp.float32)
        # folded BN + ReLU, then cast to bf16 BEFORE the pool (max commutes
        # with monotone rounding -> identical numerics, half the bytes).
        y = jnp.maximum(acc + t, 0.0).astype(jnp.bfloat16)
        y = y.reshape(l_out // 2, 2, tn, c_out)
        return jnp.maximum(y[:, 0], y[:, 1])           # MaxPool1d(2,2)

    p1 = conv_bn_relu_pool(x, w1_ref[...], t1_ref[...], L1, CP0, CP1)   # (L1P,tn,CP1)
    p2 = conv_bn_relu_pool(p1, w2_ref[...], t2_ref[...], L2, CP1, CP2)  # (L2P,tn,CP2)

    # fc1 as two full-depth K=256 matmuls (weights pre-split time-major);
    # avoids the (tn, 512) lane concat entirely.
    h = (jnp.dot(p2[0], wf1a_ref[...], preferred_element_type=jnp.float32)
         + jnp.dot(p2[1], wf1b_ref[...], preferred_element_type=jnp.float32)
         + bf1_ref[...])
    h = jnp.maximum(h, 0.0).astype(jnp.bfloat16)       # (tn, HP)
    # Dropout(p=0.5): identity in eval/inference mode.
    o_ref[...] = jnp.dot(h, wf2_ref[...],
                         preferred_element_type=jnp.float32) + bf2_ref[...]


# ------------------------- one-time parameter prep --------------------------
def prepare_params(params):
    """Fold BN, permute/pad/split weights, cast to bf16. Call once."""
    (w1, b1, w2, b2, wf1, bf1, wf2, bf2) = params

    # eval-mode BatchNorm fold (fresh module: mean=0, var=1, gamma=1, beta=0).
    # TODO(synk): with a trained checkpoint, plug the real running stats and
    #             affine params into this fold.
    def bn_fold(w, b, c_out):
        gamma = jnp.ones((c_out,), jnp.float32)
        beta = jnp.zeros((c_out,), jnp.float32)
        mean = jnp.zeros((c_out,), jnp.float32)
        var = jnp.ones((c_out,), jnp.float32)
        s = gamma / jnp.sqrt(var + BN_EPS)
        return w * s[:, None, None], b * s + (beta - mean * s)

    def pack_conv(w, b, c_in, c_out, cp_in, cp_out):
        ws, bs = bn_fold(w, b, c_out)
        wt = jnp.transpose(ws, (2, 1, 0))                  # (K, c_in, c_out)
        wp = jnp.zeros((K, cp_in, cp_out), jnp.float32)
        wp = wp.at[:, :c_in, :c_out].set(wt).reshape(K * cp_in, cp_out)
        tp = jnp.zeros((1, cp_out), jnp.float32).at[0, :c_out].set(bs)
        return wp.astype(jnp.bfloat16), tp

    w1p, t1p = pack_conv(w1, b1, C0, C1, CP0, CP1)        # (K*CP0, CP1)
    w2p, t2p = pack_conv(w2, b2, C1, C2, CP1, CP2)        # (K*CP1, CP2)

    # fc1: torch flat index j = c*2 + t. Split into per-timestep weights so
    # the kernel does h = p2[0]@Wa + p2[1]@Wb. Pad H -> HP with zeros.
    wf1t = wf1.T                                           # (L2P*C2, H)
    wf1a = jnp.zeros((CP2, HP), jnp.float32).at[:C2, :H].set(wf1t[0::L2P])
    wf1b = jnp.zeros((CP2, HP), jnp.float32).at[:C2, :H].set(wf1t[1::L2P])
    bf1k = jnp.zeros((1, HP), jnp.float32).at[0, :H].set(bf1)

    # fc2: pad 5 output classes to 128 lanes (lane-dense output stores) and
    # H -> HP rows (padded h lanes are exactly 0, matching zero rows here).
    wf2k = jnp.zeros((HP, NP), jnp.float32).at[:H, :NCLS].set(wf2.T)
    bf2k = jnp.zeros((1, NP), jnp.float32).at[0, :NCLS].set(bf2)

    return (w1p, t1p, w2p, t2p,
            wf1a.astype(jnp.bfloat16), wf1b.astype(jnp.bfloat16), bf1k,
            wf2k.astype(jnp.bfloat16), bf2k)


# ------------------------------ wrapper --------------------------------------
def cnn_forward(x_ncl, prep, tile_n=256):
    """x_ncl: (N, 100, 14) float32 (PyTorch NCL). Returns (N, 5) float32.

    For very large batches on v6e, tile_n=512 shaves a few % of per-step
    overhead; VMEM footprint stays far under the 32 MiB limit below.
    """
    (w1p, t1p, w2p, t2p, wf1a, wf1b, bf1k, wf2k, bf2k) = prep
    n = x_ncl.shape[0]

    # bf16 sublane tile is (16,128) -> tn multiple of 16; cap tn so the batch
    # grid has >= 2 steps (double-buffer overlap + v7x dual-TC sharding).
    tn = _round_up(min(tile_n, max(n // 2, 16)), 16)
    npad = _round_up(n, tn)
    grid = (npad // tn,)

    # NCL -> time-major (L0, Npad, CP0), lane-padded channels, bf16.
    # (Separate XLA op; drop if the producer can emit this layout directly.)
    x3 = jnp.transpose(x_ncl, (2, 0, 1))
    x3 = jnp.pad(x3, ((0, 0), (0, npad - n), (0, CP0 - C0))).astype(jnp.bfloat16)

    def const_spec(shape):
        return pl.BlockSpec(shape, lambda i, _n=len(shape): (0,) * _n)

    out = pl.pallas_call(
        cnn_kernel,
        out_shape=jax.ShapeDtypeStruct((npad, NP), jnp.float32),
        grid=grid,
        in_specs=[
            pl.BlockSpec((L0, tn, CP0), lambda i: (0, i, 0)),   # activations
            const_spec(w1p.shape), const_spec(t1p.shape),
            const_spec(w2p.shape), const_spec(t2p.shape),
            const_spec(wf1a.shape), const_spec(wf1b.shape), const_spec(bf1k.shape),
            const_spec(wf2k.shape), const_spec(bf2k.shape),
        ],
        out_specs=pl.BlockSpec((tn, NP), lambda i: (i, 0)),
        compiler_params=pltpu.CompilerParams(
            dimension_semantics=("parallel",),
            vmem_limit_bytes=32 * 1024 * 1024),
    )(x3, w1p, t1p, w2p, t2p, wf1a, wf1b, bf1k, wf2k, bf2k)

    return out[:n, :NCLS]


# ---------------------------- pure-JAX reference -----------------------------
def ref_forward(x_ncl, params):
    """PyTorch eval-mode semantics in plain JAX (f32)."""
    (w1, b1, w2, b2, wf1, bf1, wf2, bf2) = params
    n = x_ncl.shape[0]
    bn = lambda y: y / jnp.sqrt(1.0 + BN_EPS)
    dn = ('NCH', 'OIH', 'NCH')
    y = lax.conv_general_dilated(x_ncl, w1, (1,), 'VALID', dimension_numbers=dn)
    y = jnp.maximum(bn(y + b1[None, :, None]), 0.0)
    y = jnp.max(y.reshape(n, C1, L1P, 2), axis=-1)
    y = lax.conv_general_dilated(y, w2, (1,), 'VALID', dimension_numbers=dn)
    y = jnp.maximum(bn(y + b2[None, :, None]), 0.0)
    y = jnp.max(y.reshape(n, C2, L2P, 2), axis=-1)
    flat = y.reshape(n, C2 * L2P)                    # torch view: j = c*2 + t
    h = jnp.maximum(flat @ wf1.T + bf1, 0.0)
    return h @ wf2.T + bf2


# ------------------------------- demo / check --------------------------------
if __name__ == "__main__":
    key = jax.random.PRNGKey(0)
    ks = jax.random.split(key, 9)
    w1 = 0.05 * jax.random.normal(ks[0], (C1, C0, K), jnp.float32)
    b1 = 0.05 * jax.random.normal(ks[1], (C1,), jnp.float32)
    w2 = 0.05 * jax.random.normal(ks[2], (C2, C1, K), jnp.float32)
    b2 = 0.05 * jax.random.normal(ks[3], (C2,), jnp.float32)
    wf1 = 0.05 * jax.random.normal(ks[4], (H, L2P * C2), jnp.float32)
    bf1 = 0.05 * jax.random.normal(ks[5], (H,), jnp.float32)
    wf2 = 0.05 * jax.random.normal(ks[6], (NCLS, H), jnp.float32)
    bf2 = 0.05 * jax.random.normal(ks[7], (NCLS,), jnp.float32)

    N = 40
    x = jax.random.normal(ks[8], (N, C0, L0), jnp.float32)    # PyTorch NCL

    # Quantize x / params once to the bf16 grid so kernel (bf16 matmuls) and
    # the f32 reference see identical operands; remaining diff is accumulation.
    xq = x.astype(jnp.bfloat16).astype(jnp.float32)
    paramsq = tuple(p.astype(jnp.bfloat16).astype(jnp.float32)
                    for p in (w1, b1, w2, b2, wf1, bf1, wf2, bf2))

    prep = prepare_params(paramsq)                   # one-time weight layout
    out = jax.block_until_ready(cnn_forward(xq, prep, tile_n=16))  # grid=(3,)
    ref = jax.block_until_ready(ref_forward(xq, paramsq))

    assert out.shape == (N, NCLS)
    err = float(jnp.max(jnp.abs(out - ref)))
    assert jnp.allclose(out, ref, atol=3e-2, rtol=3e-2), err
    print("KERNEL_OK")
</pallas_src>

<mosaic_0001>
module attributes {stable_mosaic.version = 11 : i64} {
  func.func @cnn_kernel(%arg0: i32, %arg1: memref<14x16x128xbf16, #tpu.memory_space<vmem>>, %arg2: memref<384x128xbf16, #tpu.memory_space<vmem>>, %arg3: memref<1x128xf32, #tpu.memory_space<vmem>>, %arg4: memref<384x256xbf16, #tpu.memory_space<vmem>>, %arg5: memref<1x256xf32, #tpu.memory_space<vmem>>, %arg6: memref<256x1024xbf16, #tpu.memory_space<vmem>>, %arg7: memref<256x1024xbf16, #tpu.memory_space<vmem>>, %arg8: memref<1x1024xf32, #tpu.memory_space<vmem>>, %arg9: memref<1024x128xbf16, #tpu.memory_space<vmem>>, %arg10: memref<1x128xf32, #tpu.memory_space<vmem>>, %arg11: memref<16x128xf32, #tpu.memory_space<vmem>>) attributes {dimension_semantics = [#tpu.dimension_semantics<parallel>], iteration_bounds = array<i64: 3>, scalar_prefetch = 0 : i64, scratch_operands = 0 : i64, tpu.core_type = #tpu.core_type<tc>, window_params = [{transform_indices = @transform_0, window_bounds = array<i64: 14, 16, 128>}, {pipeline_mode = #tpu.pipeline_mode<synchronous>, transform_indices = @transform_1, window_bounds = array<i64: 384, 128>}, {pipeline_mode = #tpu.pipeline_mode<synchronous>, transform_indices = @transform_2, window_bounds = array<i64: 1, 128>}, {pipeline_mode = #tpu.pipeline_mode<synchronous>, transform_indices = @transform_3, window_bounds = array<i64: 384, 256>}, {pipeline_mode = #tpu.pipeline_mode<synchronous>, transform_indices = @transform_4, window_bounds = array<i64: 1, 256>}, {pipeline_mode = #tpu.pipeline_mode<synchronous>, transform_indices = @transform_5, window_bounds = array<i64: 256, 1024>}, {pipeline_mode = #tpu.pipeline_mode<synchronous>, transform_indices = @transform_6, window_bounds = array<i64: 256, 1024>}, {pipeline_mode = #tpu.pipeline_mode<synchronous>, transform_indices = @transform_7, window_bounds = array<i64: 1, 1024>}, {pipeline_mode = #tpu.pipeline_mode<synchronous>, transform_indices = @transform_8, window_bounds = array<i64: 1024, 128>}, {pipeline_mode = #tpu.pipeline_mode<synchronous>, transform_indices = @transform_9, window_bounds = array<i64: 1, 128>}, {transform_indices = @transform_10, window_bounds = array<i64: 16, 128>}]} {
    %c0 = arith.constant 0 : index
    %c0_0 = arith.constant 0 : index
    %c0_1 = arith.constant 0 : index
    %0 = vector.load %arg1[%c0, %c0_0, %c0_1] : memref<14x16x128xbf16, #tpu.memory_space<vmem>>, vector<14x16x128xbf16>
    %c0_2 = arith.constant 0 : index
    %c0_3 = arith.constant 0 : index
    %1 = vector.load %arg2[%c0_2, %c0_3] : memref<384x128xbf16, #tpu.memory_space<vmem>>, vector<384x128xbf16>
    %c0_4 = arith.constant 0 : index
    %c0_5 = arith.constant 0 : index
    %2 = vector.load %arg3[%c0_4, %c0_5] : memref<1x128xf32, #tpu.memory_space<vmem>>, vector<1x128xf32>
    %3 = vector.extract_strided_slice %0 {offsets = [0, 0, 0], sizes = [12, 16, 128], strides = [1, 1, 1]} : vector<14x16x128xbf16> to vector<12x16x128xbf16>
    %4 = vector.extract_strided_slice %0 {offsets = [1, 0, 0], sizes = [12, 16, 128], strides = [1, 1, 1]} : vector<14x16x128xbf16> to vector<12x16x128xbf16>
    %5 = vector.extract_strided_slice %0 {offsets = [2, 0, 0], sizes = [12, 16, 128], strides = [1, 1, 1]} : vector<14x16x128xbf16> to vector<12x16x128xbf16>
    %6 = tpu.concatenate %3, %4, %5 in 2 : vector<12x16x128xbf16>, vector<12x16x128xbf16>, vector<12x16x128xbf16> -> vector<12x16x384xbf16>
    %7 = vector.shape_cast %6 : vector<12x16x384xbf16> to vector<192x384xbf16>
    %cst = arith.constant dense<0.000000e+00> : vector<192x128xf32>
    %8 = tpu.matmul %7, %1, %cst {dimension_numbers = #tpu.dot_dimension_numbers<[1], [0], [0], [1], [0, 0, 1, 1], [], []>} : vector<192x384xbf16>, vector<384x128xbf16>, vector<192x128xf32> -> vector<192x128xf32>
    %9 = vector.broadcast %2 : vector<1x128xf32> to vector<192x128xf32>
    %10 = arith.addf %8, %9 : vector<192x128xf32>
    %cst_6 = arith.constant 0.000000e+00 : f32
    %11 = vector.broadcast %cst_6 : f32 to vector<192x128xf32>
    %12 = arith.maximumf %10, %11 : vector<192x128xf32>
    %13 = arith.truncf %12 : vector<192x128xf32> to vector<192x128xbf16>
    %14 = vector.shape_cast %13 : vector<192x128xbf16> to vector<6x2x16x128xbf16>
    %15 = vector.extract_strided_slice %14 {offsets = [0, 0, 0, 0], sizes = [6, 1, 16, 128], strides = [1, 1, 1, 1]} : vector<6x2x16x128xbf16> to vector<6x1x16x128xbf16>
    %16 = vector.shape_cast %15 : vector<6x1x16x128xbf16> to vector<6x16x128xbf16>
    %17 = vector.extract_strided_slice %14 {offsets = [0, 1, 0, 0], sizes = [6, 1, 16, 128], strides = [1, 1, 1, 1]} : vector<6x2x16x128xbf16> to vector<6x1x16x128xbf16>
    %18 = vector.shape_cast %17 : vector<6x1x16x128xbf16> to vector<6x16x128xbf16>
    %19 = arith.maximumf %16, %18 : vector<6x16x128xbf16>
    %c0_7 = arith.constant 0 : index
    %c0_8 = arith.constant 0 : index
    %20 = vector.load %arg4[%c0_7, %c0_8] : memref<384x256xbf16, #tpu.memory_space<vmem>>, vector<384x256xbf16>
    %c0_9 = arith.constant 0 : index
    %c0_10 = arith.constant 0 : index
    %21 = vector.load %arg5[%c0_9, %c0_10] : memref<1x256xf32, #tpu.memory_space<vmem>>, vector<1x256xf32>
    %22 = vector.extract_strided_slice %19 {offsets = [0, 0, 0], sizes = [4, 16, 128], strides = [1, 1, 1]} : vector<6x16x128xbf16> to vector<4x16x128xbf16>
    %23 = vector.extract_strided_slice %19 {offsets = [1, 0, 0], sizes = [4, 16, 128], strides = [1, 1, 1]} : vector<6x16x128xbf16> to vector<4x16x128xbf16>
    %24 = vector.extract_strided_slice %19 {offsets = [2, 0, 0], sizes = [4, 16, 128], strides = [1, 1, 1]} : vector<6x16x128xbf16> to vector<4x16x128xbf16>
    %25 = tpu.concatenate %22, %23, %24 in 2 : vector<4x16x128xbf16>, vector<4x16x128xbf16>, vector<4x16x128xbf16> -> vector<4x16x384xbf16>
    %26 = vector.shape_cast %25 : vector<4x16x384xbf16> to vector<64x384xbf16>
    %cst_11 = arith.constant dense<0.000000e+00> : vector<64x256xf32>
    %27 = tpu.matmul %26, %20, %cst_11 {dimension_numbers = #tpu.dot_dimension_numbers<[1], [0], [0], [1], [0, 0, 1, 1], [], []>} : vector<64x384xbf16>, vector<384x256xbf16>, vector<64x256xf32> -> vector<64x256xf32>
    %28 = vector.broadcast %21 : vector<1x256xf32> to vector<64x256xf32>
    %29 = arith.addf %27, %28 : vector<64x256xf32>
    %cst_12 = arith.constant 0.000000e+00 : f32
    %30 = vector.broadcast %cst_12 : f32 to vector<64x256xf32>
    %31 = arith.maximumf %29, %30 : vector<64x256xf32>
    %32 = arith.truncf %31 : vector<64x256xf32> to vector<64x256xbf16>
    %33 = vector.shape_cast %32 : vector<64x256xbf16> to vector<2x2x16x256xbf16>
    %34 = vector.extract_strided_slice %33 {offsets = [0, 0, 0, 0], sizes = [2, 1, 16, 256], strides = [1, 1, 1, 1]} : vector<2x2x16x256xbf16> to vector<2x1x16x256xbf16>
    %35 = vector.shape_cast %34 : vector<2x1x16x256xbf16> to vector<2x16x256xbf16>
    %36 = vector.extract_strided_slice %33 {offsets = [0, 1, 0, 0], sizes = [2, 1, 16, 256], strides = [1, 1, 1, 1]} : vector<2x2x16x256xbf16> to vector<2x1x16x256xbf16>
    %37 = vector.shape_cast %36 : vector<2x1x16x256xbf16> to vector<2x16x256xbf16>
    %38 = arith.maximumf %35, %37 : vector<2x16x256xbf16>
    %39 = vector.extract_strided_slice %38 {offsets = [0, 0, 0], sizes = [1, 16, 256], strides = [1, 1, 1]} : vector<2x16x256xbf16> to vector<1x16x256xbf16>
    %40 = vector.shape_cast %39 : vector<1x16x256xbf16> to vector<16x256xbf16>
    %c0_13 = arith.constant 0 : index
    %c0_14 = arith.constant 0 : index
    %41 = vector.load %arg6[%c0_13, %c0_14] : memref<256x1024xbf16, #tpu.memory_space<vmem>>, vector<256x1024xbf16>
    %cst_15 = arith.constant dense<0.000000e+00> : vector<16x1024xf32>
    %42 = tpu.matmul %40, %41, %cst_15 {dimension_numbers = #tpu.dot_dimension_numbers<[1], [0], [0], [1], [0, 0, 1, 1], [], []>} : vector<16x256xbf16>, vector<256x1024xbf16>, vector<16x1024xf32> -> vector<16x1024xf32>
    %43 = vector.extract_strided_slice %38 {offsets = [1, 0, 0], sizes = [1, 16, 256], strides = [1, 1, 1]} : vector<2x16x256xbf16> to vector<1x16x256xbf16>
    %44 = vector.shape_cast %43 : vector<1x16x256xbf16> to vector<16x256xbf16>
    %c0_16 = arith.constant 0 : index
    %c0_17 = arith.constant 0 : index
    %45 = vector.load %arg7[%c0_16, %c0_17] : memref<256x1024xbf16, #tpu.memory_space<vmem>>, vector<256x1024xbf16>
    %cst_18 = arith.constant dense<0.000000e+00> : vector<16x1024xf32>
    %46 = tpu.matmul %44, %45, %cst_18 {dimension_numbers = #tpu.dot_dimension_numbers<[1], [0], [0], [1], [0, 0, 1, 1], [], []>} : vector<16x256xbf16>, vector<256x1024xbf16>, vector<16x1024xf32> -> vector<16x1024xf32>
    %47 = arith.addf %42, %46 : vector<16x1024xf32>
    %c0_19 = arith.constant 0 : index
    %c0_20 = arith.constant 0 : index
    %48 = vector.load %arg8[%c0_19, %c0_20] : memref<1x1024xf32, #tpu.memory_space<vmem>>, vector<1x1024xf32>
    %49 = vector.broadcast %48 : vector<1x1024xf32> to vector<16x1024xf32>
    %50 = arith.addf %47, %49 : vector<16x1024xf32>
    %cst_21 = arith.constant 0.000000e+00 : f32
    %51 = vector.broadcast %cst_21 : f32 to vector<16x1024xf32>
    %52 = arith.maximumf %50, %51 : vector<16x1024xf32>
    %53 = arith.truncf %52 : vector<16x1024xf32> to vector<16x1024xbf16>
    %c0_22 = arith.constant 0 : index
    %c0_23 = arith.constant 0 : index
    %54 = vector.load %arg9[%c0_22, %c0_23] : memref<1024x128xbf16, #tpu.memory_space<vmem>>, vector<1024x128xbf16>
    %cst_24 = arith.constant dense<0.000000e+00> : vector<16x128xf32>
    %55 = tpu.matmul %53, %54, %cst_24 {dimension_numbers = #tpu.dot_dimension_numbers<[1], [0], [0], [1], [0, 0, 1, 1], [], []>} : vector<16x1024xbf16>, vector<1024x128xbf16>, vector<16x128xf32> -> vector<16x128xf32>
    %c0_25 = arith.constant 0 : index
    %c0_26 = arith.constant 0 : index
    %56 = vector.load %arg10[%c0_25, %c0_26] : memref<1x128xf32, #tpu.memory_space<vmem>>, vector<1x128xf32>
    %57 = vector.broadcast %56 : vector<1x128xf32> to vector<16x128xf32>
    %58 = arith.addf %55, %57 : vector<16x128xf32>
    %c0_27 = arith.constant 0 : index
    %c0_28 = arith.constant 0 : index
    %59 = vector.load %arg11[%c0_27, %c0_28] : memref<16x128xf32, #tpu.memory_space<vmem>>, vector<16x128xf32>
    tpu.vector_store %arg11[%c0_27, %c0_28], %58 {strides = array<i32>} : memref<16x128xf32, #tpu.memory_space<vmem>>, vector<16x128xf32>,
    return
  }
  func.func @transform_0(%arg0: i32) -> (i32, i32, i32) {
    %c0_i32 = arith.constant 0 : i32
    %c0_i32_0 = arith.constant 0 : i32
    %c0_i32_1 = arith.constant 0 : i32
    return %c0_i32, %arg0, %c0_i32_0 : i32, i32, i32
  }
  func.func @transform_1(%arg0: i32) -> (i32, i32) {
    %c0_i32 = arith.constant 0 : i32
    %c0_i32_0 = arith.constant 0 : i32
    %c0_i32_1 = arith.constant 0 : i32
    return %c0_i32, %c0_i32_0 : i32, i32
  }
  func.func @transform_2(%arg0: i32) -> (i32, i32) {
    %c0_i32 = arith.constant 0 : i32
    %c0_i32_0 = arith.constant 0 : i32
    %c0_i32_1 = arith.constant 0 : i32
    return %c0_i32, %c0_i32_0 : i32, i32
  }
  func.func @transform_3(%arg0: i32) -> (i32, i32) {
    %c0_i32 = arith.constant 0 : i32
    %c0_i32_0 = arith.constant 0 : i32
    %c0_i32_1 = arith.constant 0 : i32
    return %c0_i32, %c0_i32_0 : i32, i32
  }
  func.func @transform_4(%arg0: i32) -> (i32, i32) {
    %c0_i32 = arith.constant 0 : i32
    %c0_i32_0 = arith.constant 0 : i32
    %c0_i32_1 = arith.constant 0 : i32
    return %c0_i32, %c0_i32_0 : i32, i32
  }
  func.func @transform_5(%arg0: i32) -> (i32, i32) {
    %c0_i32 = arith.constant 0 : i32
    %c0_i32_0 = arith.constant 0 : i32
    %c0_i32_1 = arith.constant 0 : i32
    return %c0_i32, %c0_i32_0 : i32, i32
  }
  func.func @transform_6(%arg0: i32) -> (i32, i32) {
    %c0_i32 = arith.constant 0 : i32
    %c0_i32_0 = arith.constant 0 : i32
    %c0_i32_1 = arith.constant 0 : i32
    return %c0_i32, %c0_i32_0 : i32, i32
  }
  func.func @transform_7(%arg0: i32) -> (i32, i32) {
    %c0_i32 = arith.constant 0 : i32
    %c0_i32_0 = arith.constant 0 : i32
    %c0_i32_1 = arith.constant 0 : i32
    return %c0_i32, %c0_i32_0 : i32, i32
  }
  func.func @transform_8(%arg0: i32) -> (i32, i32) {
    %c0_i32 = arith.constant 0 : i32
    %c0_i32_0 = arith.constant 0 : i32
    %c0_i32_1 = arith.constant 0 : i32
    return %c0_i32, %c0_i32_0 : i32, i32
  }
  func.func @transform_9(%arg0: i32) -> (i32, i32) {
    %c0_i32 = arith.constant 0 : i32
    %c0_i32_0 = arith.constant 0 : i32
    %c0_i32_1 = arith.constant 0 : i32
    return %c0_i32, %c0_i32_0 : i32, i32
  }
  func.func @transform_10(%arg0: i32) -> (i32, i32) {
    %c0_i32 = arith.constant 0 : i32
    %c0_i32_0 = arith.constant 0 : i32
    return %arg0, %c0_i32 : i32, i32
  }
}

</mosaic_0001>

<bundles_post_ra>
// kernel: tpu_custom_call.1
= control target key start
LH: loop header
LB: loop body
LE: loop exit
PB: predicated region body
PF: predicated region fallthrough
CT: control target
= control target key end

     0   :  { %s6138_s0 = inlined_call_operand.hbm [shape: bf16[14,48,128], index: 0, kind: input, shape index: {}]   ;;  %s6139_s1 = inlined_call_operand.hbm [shape: bf16[384,128], index: 1, kind: input, shape index: {}]   ;;  %s6140_s2 = inlined_call_operand.vmem [shape: f32[1,128], index: 2, kind: input, shape index: {}]   ;;  %s6141_s3 = inlined_call_operand.hbm [shape: bf16[384,256], index: 3, kind: input, shape index: {}]   ;;  %s6142_s4 = inlined_call_operand.vmem [shape: f32[1,256], index: 4, kind: input, shape index: {}]   ;;  %s6143_s5 = inlined_call_operand.hbm [shape: bf16[256,1024], index: 5, kind: input, shape index: {}]   ;;  %s6144_s6 = inlined_call_operand.hbm [shape: bf16[256,1024], index: 6, kind: input, shape index: {}]   ;;  %s6145_s7 = inlined_call_operand.vmem [shape: f32[1,1024], index: 7, kind: input, shape index: {}]   ;;  %s6146_s8 = inlined_call_operand.hbm [shape: bf16[1024,128], index: 8, kind: input, shape index: {}]   ;;  %s6147_s9 = inlined_call_operand.vmem [shape: f32[1,128], index: 9, kind: input, shape index: {}]   ;;  %s6148_s10 = inlined_call_operand.hbm [shape: f32[48,128], index: 10, kind: output, shape index: {}]  }
   0x1   :  { %6165 = sst [smem:[#allocation27_spill]] %s6139_s1 }
   0x2   :  { %6166 = sst [smem:[#allocation28_spill]] %s6147_s9 }
   0x3   :  { %6167 = sst [smem:[#allocation29_spill]] %s6148_s10 }
   0x4   :  { %15 = vsyncpa [#allocation3], 0 }
   0x5   :  { %17 = vsyncpa [#allocation3 + $0x1], 0 }
   0x6   :  { %18 = vsyncpa [#allocation6], 0 }
   0x7   :  { %19 = vsyncpa [#allocation9], 0 }
   0x8   :  { %20 = vsyncpa [#allocation12], 0 }
   0x9   :  { %21 = vsyncpa [#allocation4], 0 }
   0xa   :  { %23 = vsyncpa [#allocation4 + $0x1], 0  ;;  %s5666_s13 = smov 0   ;;  %s5668_s14 = smov 0  }
   0xb   :  { %s5670_s15 = smov 0   ;;  %s5672_s16 = smov 0  }
   0xc LB: > { %6168 = sst [smem:[#allocation22_spill]] %s5576_s13  ;;  %s5687_s17 = sadd.s32 4294967295, %s5588_s16   ;;  %s5588_s16 = sphi %s5672_s16, %s6201_s16   ;;  %s5584_s15 = sphi %s5670_s15, %s6205_s15   ;;  %s5580_s14 = sphi %s5668_s14, %s6204_s14   ;;  %s5576_s13 = sphi %s5666_s13, %s6203_s13  }
   0xd   : > { %s4346_s18 = sadd.s32 4294967294, %s5588_s16   ;;  %s5691_s19 = sadd.s32 1, %s5588_s16  }
   0xe   : > { %6169 = sst [smem:[#allocation23_spill]] %s5691_s19  ;;  %s36_s20 = sadd.s32 1, %s5584_s15 }
   0xf   : > { %s33_s21 = ssub.s32 %s5588_s16, %s5691_s19  ;;  %p43_p0 = scmp.ne.s32.totalorder %s5584_s15, %s5580_s14 }
  0x10   : > { %p34_p1 = scmp.eq.s32.totalorder %s33_s21, 0  ;;  %p44_p2 = scmp.eq.s32.totalorder %s5588_s16, 0 }
  0x11   : > { %p49_p3 = scmp.ne.s32.totalorder %s5580_s14, %s5576_s13  ;;  %p6152_p4 = scmp.eq.s32.totalorder %s5687_s17, 0 }
  0x12   : > { %s5703_s22 = scalar_select %p34_p1, %s5584_s15, %s36_s20  }
  0x13   : > { %p5705_p5 = por %p44_p2, %p43_p0  ;;  %p5711_p6 = por %p6152_p4, %p49_p3 }
  0x14   : > { %6170 = sst [smem:[#allocation24_spill]] %s5703_s22  ;;  %p262_p7 = scmp.eq.s32.totalorder %s5687_s17, 2 }
  0x15   : > { %s6171_s23 = scalar_select %p5705_p5, 1, 0 }
  0x16   : > { %s6172_s24 = scalar_select %p5711_p6, 1, 0 }
  0x17   : > { %p268_p8 = scmp.eq.s32.totalorder %s4346_s18, 2  ;;  %p4347_p9 = scmp.ge.s32.totalorder %s5588_s16, 1 }
  0x18   : > { %p275_p10 = scmp.lt.s32.totalorder %s5588_s16, 4  ;;  %p5718_p11 = por %p262_p7, %p43_p0 }
  0x19   : > { %p5722_p12 = por %p268_p8, %p49_p3  ;;  %s5590_s28 = smov [#allocation5]  }
  0x1a   : > { %s6173_s25 = scalar_select %p5718_p11, 1, 0 }
  0x1b   : > { %s6175_s26 = scalar_select %p5722_p12, 1, 0 }
  0x1c   : > { %6174 = sst [smem:[#allocation25_spill]] %s6173_s25  ;;  %p5726_p13 = pnand %p4347_p9, %p275_p10 }
  0x1d   : > { %6176 = sst [smem:[#allocation26_spill]] %s6175_s26  ;;  %s287_s29 = sshll.u32 %s5590_s28, 4  ;;  %s288_s29 = int_to_ptr.vmem [resolvable:$true] %s287_s29 }
  0x1e   : > { %s6177_s27 = scalar_select %p5726_p13, 1, 0 }
  0x1f   : > { %p5113_p1 = pneg %p5726_p13  ;;  %s5591_s11 = smov [#allocation8]  }
  0x20   : > { %s319_s12 = sshll.u32 %s5591_s11, 4  ;;  %s6179_s1 = sld [smem:[#allocation27_spill]]  ;;  %s5738_s12 = int_to_ptr.vmem [resolvable:$true] %s319_s12 }
  0x21   : > { %p5734_p2 = pnand %p5113_p1, %p6152_p4 }
  0x23   : > { %p5748_p3 = pneg %p5734_p2 }
  0x26   : > { %s5370_s21 = scalar_lea.hbm %s6179_s1, 3072 }
  0x27   : > { %p5371_p0 = scmp.ne.s32.totalorder %s6179_s1, %s5370_s21  ;;  %p5377_p9 = scmp.lt.u32.totalorder %s5370_s21, %s6179_s1 }
  0x29   : > { %p5373_p7 = pnand %p5748_p3, %p5371_p0 }
  0x2b   : > { %p5374_p8 = pneg %p5373_p7 }
  0x2d   : > { %p5379_p10 = pnand %p5377_p9, %p5374_p8 }
  0x2f   : > { %5382 = shalt.err (!%p5379_p10)
}
  0x30   : > { %s5383_s18 = scalar_lea.vmem %s288_s29, 3072  ;;  %p5391_p11 = scmp.lt.s32.totalorder %s288_s29, %s288_s29 }
  0x31   : > { %p5384_p1 = scmp.ne.s32.totalorder %s288_s29, %s5383_s18  ;;  %p5392_p6 = scmp.lt.s32.totalorder %s5383_s18, %s5383_s18 }
  0x33   : > { %p5386_p4 = pnand %p5384_p1, %p5748_p3  ;;  %p5393_p13 = por %p5392_p6, %p5391_p11 }
  0x35   : > { %p5387_p12 = pneg %p5386_p4 }
  0x37   : > { %p5394_p5 = pnand %p5393_p13, %p5387_p12 }
  0x39   : > { %5397 = shalt.err (!%p5394_p5)
}
  0x3a   : > { %s6161_s19 = smov 64   ;;  %s6162_s22 = smov 4  }
  0x3b   : > { %5116 = dma.hbm_to_vmem [thread:$0]  (!%p5734_p2), %s6179_s1, 3072, %s288_s29, [#allocation6], %s6161_s19, %s6161_s19, %s6162_s22  }
  0x3c   : > { %s5398_s13 = scalar_lea.hbm %s6143_s5, 16384 }
  0x3d   : > { %p5399_p4 = scmp.ne.s32.totalorder %s6143_s5, %s5398_s13  ;;  %p5405_p11 = scmp.lt.u32.totalorder %s5398_s13, %s6143_s5 }
  0x3f   : > { %p5401_p5 = pnand %p5399_p4, %p5748_p3 }
  0x41   : > { %p5402_p6 = pneg %p5401_p5 }
  0x43   : > { %p5407_p12 = pnand %p5405_p11, %p5402_p6 }
  0x45   : > { %5410 = shalt.err (!%p5407_p12)
}
  0x46   : > { %s5411_s29 = scalar_lea.vmem %s5738_s12, 16384  ;;  %p5419_p8 = scmp.lt.s32.totalorder %s5738_s12, %s5738_s12 }
  0x47   : > { %p5412_p13 = scmp.ne.s32.totalorder %s5738_s12, %s5411_s29  ;;  %p5420_p9 = scmp.lt.s32.totalorder %s5411_s29, %s5411_s29 }
  0x49   : > { %p5414_p0 = pnand %p5412_p13, %p5748_p3  ;;  %p5421_p10 = por %p5420_p9, %p5419_p8 }
  0x4b   : > { %p5415_p7 = pneg %p5414_p0 }
  0x4d   : > { %p5422_p1 = pnand %p5421_p10, %p5415_p7 }
  0x4f   : > { %5425 = shalt.err (!%p5422_p1)
}
  0x50   : > { %s6163_s10 = smov 512   ;;  %s6164_s9 = smov 32  }
  0x51   : > { %5122 = dma.hbm_to_vmem [thread:$0]  (!%p5734_p2), %s6143_s5, 16384, %s5738_s12, [#allocation9], %s6163_s10, %s6163_s10, %s6164_s9  }
  0x52   : > { %s5596_s26 = smov [#allocation7]   ;;  %s5426_s18 = scalar_lea.hbm %s6141_s3, 6144 }
  0x53   : > { %s303_s20 = sshll.u32 %s5596_s26, 4  ;;  %p5427_p4 = scmp.ne.s32.totalorder %s6141_s3, %s5426_s18  ;;  %s304_s20 = int_to_ptr.vmem [resolvable:$true] %s303_s20 }
  0x54   : > { %p5433_p11 = scmp.lt.u32.totalorder %s5426_s18, %s6141_s3 }
  0x55   : > { %p5429_p5 = pnand %p5427_p4, %p5748_p3 }
  0x57   : > { %p5430_p6 = pneg %p5429_p5 }
  0x59   : > { %p5435_p12 = pnand %p5433_p11, %p5430_p6 }
  0x5b   : > { %5438 = shalt.err (!%p5435_p12)
}
  0x5c   : > { %s5439_s12 = scalar_lea.vmem %s304_s20, 6144  ;;  %p5447_p8 = scmp.lt.s32.totalorder %s304_s20, %s304_s20 }
  0x5d   : > { %p5440_p13 = scmp.ne.s32.totalorder %s304_s20, %s5439_s12  ;;  %p5448_p9 = scmp.lt.s32.totalorder %s5439_s12, %s5439_s12 }
  0x5f   : > { %p5442_p0 = pnand %p5440_p13, %p5748_p3  ;;  %p5449_p10 = por %p5448_p9, %p5447_p8 }
  0x61   : > { %p5443_p7 = pneg %p5442_p0 }
  0x63   : > { %p5450_p1 = pnand %p5449_p10, %p5443_p7 }
  0x65   : > { %5453 = shalt.err (!%p5450_p1)
}
  0x66   : > { %s5597_s19 = smov 128   ;;  %s5598_s13 = smov 8  }
  0x67   : > { %5119 = dma.hbm_to_vmem [thread:$0]  (!%p5734_p2), %s6141_s3, 6144, %s304_s20, [#allocation6], %s5597_s19, %s5597_s19, %s5598_s13  }
  0x68   : > { %s5599_s25 = smov [#allocation10]   ;;  %s5600_s21 = smov [#allocation11]  }
  0x69   : > { %s332_s26 = sshll.u32 %s5599_s25, 4  ;;  %s348_s11 = sshll.u32 %s5600_s21, 4  ;;  %s333_s26 = int_to_ptr.vmem [resolvable:$true] %s332_s26  ;;  %s5811_s11 = int_to_ptr.vmem [resolvable:$true] %s348_s11 }
  0x6a   : > { %s5454_s12 = scalar_lea.hbm %s6144_s6, 16384 }
  0x6b   : > { %p5455_p4 = scmp.ne.s32.totalorder %s6144_s6, %s5454_s12  ;;  %p5461_p11 = scmp.lt.u32.totalorder %s5454_s12, %s6144_s6 }
  0x6d   : > { %p5457_p5 = pnand %p5455_p4, %p5748_p3 }
  0x6f   : > { %p5458_p6 = pneg %p5457_p5 }
  0x71   : > { %p5463_p12 = pnand %p5461_p11, %p5458_p6 }
  0x73   : > { %5466 = shalt.err (!%p5463_p12)
}
  0x74   : > { %s5467_s19 = scalar_lea.vmem %s333_s26, 16384  ;;  %p5475_p8 = scmp.lt.s32.totalorder %s333_s26, %s333_s26 }
  0x75   : > { %p5468_p13 = scmp.ne.s32.totalorder %s333_s26, %s5467_s19  ;;  %p5476_p9 = scmp.lt.s32.totalorder %s5467_s19, %s5467_s19 }
  0x77   : > { %p5470_p0 = pnand %p5468_p13, %p5748_p3  ;;  %p5477_p10 = por %p5476_p9, %p5475_p8 }
  0x79   : > { %p5471_p7 = pneg %p5470_p0 }
  0x7b   : > { %p5478_p1 = pnand %p5477_p10, %p5471_p7 }
  0x7d   : > { %5481 = shalt.err (!%p5478_p1)
}
  0x7e   : > { %s6181_s10 = smov 32   ;;  %s6182_s9 = smov 512  }
  0x7f   : > { %5125 = dma.hbm_to_vmem [thread:$0]  (!%p5734_p2), %s6144_s6, 16384, %s333_s26, [#allocation9], %s6182_s9, %s6182_s9, %s6181_s10  }
  0x80   : > { %s5482_s18 = scalar_lea.hbm %s6146_s8, 8192 }
  0x81   : > { %p5483_p4 = scmp.ne.s32.totalorder %s6146_s8, %s5482_s18  ;;  %p5489_p11 = scmp.lt.u32.totalorder %s5482_s18, %s6146_s8 }
  0x83   : > { %p5485_p5 = pnand %p5483_p4, %p5748_p3 }
  0x85   : > { %p5486_p6 = pneg %p5485_p5 }
  0x87   : > { %p5491_p12 = pnand %p5489_p11, %p5486_p6 }
  0x89   : > { %5494 = shalt.err (!%p5491_p12)
}
  0x8a   : > { %s5495_s26 = scalar_lea.vmem %s5811_s11, 8192  ;;  %p5503_p8 = scmp.lt.s32.totalorder %s5811_s11, %s5811_s11 }
  0x8b   : > { %p5496_p13 = scmp.ne.s32.totalorder %s5811_s11, %s5495_s26  ;;  %p5504_p9 = scmp.lt.s32.totalorder %s5495_s26, %s5495_s26 }
  0x8d   : > { %p5498_p0 = pnand %p5496_p13, %p5748_p3  ;;  %p5505_p10 = por %p5504_p9, %p5503_p8 }
  0x8f   : > { %p5499_p7 = pneg %p5498_p0 }
  0x91   : > { %p5506_p1 = pnand %p5505_p10, %p5499_p7 }
  0x93   : > { %5509 = shalt.err (!%p5506_p1)
}
  0x94   : > { %s6183_s19 = smov 4   ;;  %s6184_s10 = smov 64  }
  0x95   : > { %5128 = dma.hbm_to_vmem [thread:$0]  (!%p5734_p2), %s6146_s8, 8192, %s5811_s11, [#allocation12], %s6184_s10, %s6184_s10, %s6183_s19  }
  0x96   : > { %p4353_p4 = scmp.ge.s32.totalorder %s5588_s16, 3 }
  0x98   : > { %361 = sbr.rel (%p4353_p4) target bundleno = 175 (0xaf), region = 52 }
  0x9f   : > { %s365_s28 = sand.u32 1, %s5584_s15   ;;  %s4778_s22 = sshll.u32 %s5588_s16, 7 }
  0xa0   : > { %s5080_s30 = smul.u32 112, %s365_s28  ;;  %s5601_s25 = smov 384  }
  0xa1   : > { %p6185_p3 = scmp.ne.s32.totalorder %s6171_s23, 0  ;;  %s375_s29 = scalar_lea.hbm %s6138_s0, %s4778_s22 }
  0xa2   : > { %s369_s1 = scalar_lea.vmem [#allocation2], %s5080_s30  ;;  %s5602_s26 = smov 128  }
  0xa3   : > { %5093 = sst [smem:[#allocation15]] (%p6185_p3), %s5601_s25  ;;  %s388_s20 = sshll.u32 %s369_s1, 4  ;;  %s389_s20 = int_to_ptr.vmem [resolvable:$true] %s388_s20 }
  0xa4   : > { %s5092_s11 = scalar_select %p6185_p3, [#allocation0], [#allocation16] }
  0xa5   : > { %5094 = sst [smem:[#allocation15 + $0x1]] (%p6185_p3), %s5602_s26  ;;  %s5603_s19 = smov 2  }
  0xa6   : > { %s380_s12 = sld [smem:[%s5092_s11]]   ;;  %s5604_s10 = smov 64  }
  0xa7   : > { %5095 = sst [smem:[#allocation15 + $0x2]] (%p6185_p3), %s5603_s19  ;;  %s5605_s9 = smov 4  }
  0xa8   : > { %5096 = sst [smem:[#allocation15 + $0x3]] (%p6185_p3), %s5604_s10  ;;  %s366_s30 = scalar_lea.sflag [#allocation3], %s365_s28 }
  0xa9   : > { %5097 = sst [smem:[#allocation15 + $0x4]] (%p6185_p3), %s5604_s10  ;;  %s5606_s25 = smov [#allocation14]  }
  0xaa   : > { %5098 = sst [smem:[#allocation15 + $0x5]] (%p6185_p3), %s5605_s9 }
  0xac   : > { %s4356_s13 = sshll.u32 %s380_s12, 26 }
  0xad   : > { %s4357_s22 = sadd.s32 134217728, %s4356_s13 }
  0xae   : > { %5099 = dma.general (%p6185_p3), %s375_s29, 1792, %s389_s20, %s366_s30, %s5606_s25, [#allocation15], %s4357_s22, 0  }
  0xaf PF: > { %p6186_p2 = scmp.ne.s32.totalorder %s6177_s27, 0 }
  0xb0   : > { %s5885_s11 = sand.u32 (!%p6186_p2), 1, %s5580_s14   ;;  %p6187_p5 = scmp.ne.s32.totalorder (!%p6186_p2), %s6172_s24, 0 }
  0xb1   : > { %413 = sbr.rel (%p6186_p2) target bundleno = 1551 (0x60f), region = 60  ;;  %s416_s18 = scalar_lea.sflag (!%p6186_p2), [#allocation3], %s5885_s11 }
  0xb2   : > { %s5081_s21 = smul.u32 (!%p6186_p2), 112, %s5885_s11 }
  0xb4   : > { %s5889_s1 = scalar_lea.vmem (!%p6186_p2), [#allocation2], %s5081_s21 }
  0xb8   : > { %5555 = dma.done.wait (%p6187_p5), %s416_s18, 1792  }
  0xb9   : > { %5557 = vsyncadd (%p6187_p5), %s416_s18, 4294965504  ;;  %p6188_p6 = scmp.eq.s32.totalorder %s5687_s17, 0 }
  0xbb   : > { %5559 = dma.done.wait (%p6188_p6), [#allocation6], 9216   ;;  %p6189_p11 = pmov %p6188_p6 }
  0xbc   : > { %p6190_p12 = pmov %p6188_p6 }
  0xbd   : > { %5561 = vsyncadd (%p6189_p11), [#allocation6], 4294958080 }
  0xbe   : > { %5563 = dma.done.wait (%p6190_p12), [#allocation9], 32768   ;;  %p6191_p13 = pmov %p6188_p6 }
  0xbf   : > { %p6192_p0 = pmov %p6188_p6 }
  0xc0   : > { %5565 = vsyncadd (%p6191_p13), [#allocation9], 4294934528 }
  0xc1   : > { %5567 = dma.done.wait (%p6192_p0), [#allocation12], 8192   ;;  %p6193_p7 = pmov %p6192_p0 }
  0xc2   : > { %v5196_v0 = vld [vmem:[#allocation5 + $0x40] sm:$0xff]   ;;  %v5198_v2 = vld [vmem:[#allocation5 + $0x48] sm:$0xff]   ;;  %v5200_v4 = vld [vmem:[#allocation5 + $0x50] sm:$0xff]   ;;  %s6194_s19 = sld [smem:[#allocation28_spill]]  ;;  %s4364_s10 = sshll.u32 %s5885_s11, 4 }
  0xc3   : > { %5569 = vsyncadd (%p6193_p7), [#allocation12], 4294959104  ;;  %v5197_v1 = vld [vmem:[#allocation5] sm:$0xff]   ;;  %4780 = vmatprep.subr.bf16.mxu0 %v5196_v0  ;;  %5016 = vmatprep.subr.bf16.mxu1 %v5196_v0  ;;  %v5199_v3 = vld [vmem:[#allocation5 + $0x8] sm:$0xff]   ;;  %s475_s9 = scalar_lea.vmem [#allocation13], %s4364_s10  ;;  %s6195_s13 = sld [smem:[#allocation25_spill]] }
  0xc4   : > { %4781 = vmatpush3.bf16.msra.mxu0 %v5197_v1  ;;  %5024 = vmatpush3.bf16.msra.mxu1 %v5197_v1  ;;  %v5201_v5 = vld [vmem:[#allocation5 + $0x10] sm:$0xff]   ;;  %v5202_v6 = vld [vmem:[#allocation5 + $0x58] sm:$0xff]   ;;  %v5204_v8 = vld [vmem:[#allocation5 + $0x60] sm:$0xff]   ;;  %s4225_s22 = sshll.u32 %s475_s9, 4  ;;  %s4779_s30 = sshll.u32 %s5687_s17, 8  ;;  %s6090_s22 = int_to_ptr.vmem [resolvable:$true] %s4225_s22 }
  0xc5   : > { %4782 = vmatprep.subr.bf16.mxu0 %v5198_v2  ;;  %5017 = vmatprep.subr.bf16.mxu1 %v5198_v2  ;;  %v5203_v7 = vld [vmem:[#allocation5 + $0x18] sm:$0xff]   ;;  %v5205_v9 = vld [vmem:[#allocation5 + $0x20] sm:$0xff]   ;;  %v5206_v10 = vld [vmem:[#allocation5 + $0x68] sm:$0xff]   ;;  %s6196_s18 = sld [smem:[#allocation29_spill]]  ;;  %s4212_s23 = scalar_lea.sflag [#allocation4], %s5885_s11 }
  0xc6   : > { %v5212_v11 = vld [vmem:[%s5889_s1 + $0x8] sm:$0xff]   ;;  %v5208_v14 = vld [vmem:[#allocation5 + $0x70] sm:$0xff]   ;;  %v5216_v19 = vld [vmem:[#allocation5 + $0x80] sm:$0xff]   ;;  %s5510_s24 = scalar_lea.vmem %s6090_s22, 256  ;;  %s5608_s17 = smov [#allocation13]  }
  0xc7   : > { %v5909_v12 = vld [vmem:[%s5889_s1 + $0x48] sm:$0xff]   ;;  %822 = vmatprep.mubr.bf16.mxu0 %v5212_v11  ;;  %v5209_v15 = vld [vmem:[#allocation5 + $0x30] sm:$0xff]   ;;  %v5222_v25 = vld [vmem:[%s5889_s1 + $0x18] sm:$0xff]   ;;  %p5511_p8 = scmp.ne.s32.totalorder %s6090_s22, %s5510_s24  ;;  %s5514_s27 = sshll.u32 %s5608_s17, 4  ;;  %s5515_s27 = int_to_ptr.vmem [resolvable:$false] %s5514_s27 }
  0xc8   : > { %4783 = vmatpush3.bf16.msra.mxu0 %v5199_v3  ;;  %5025 = vmatpush3.bf16.msra.mxu1 %v5199_v3  ;;  %v5207_v13 = vld [vmem:[#allocation5 + $0x28] sm:$0xff]   ;;  %v5210_v16 = vld [vmem:[#allocation5 + $0x78] sm:$0xff]   ;;  %v5214_v18 = vld [vmem:[%s5889_s1] sm:$0xff]   ;;  %s5516_s28 = scalar_lea.vmem %s5515_s27, 512  ;;  %p5517_p4 = scmp.lt.s32.totalorder %s6090_s22, %s5515_s27 }
  0xc9   : > { %4784 = vmatprep.subr.bf16.mxu0 %v5200_v4  ;;  %5018 = vmatprep.subr.bf16.mxu1 %v5200_v4  ;;  %v5211_v17 = vld [vmem:[#allocation5 + $0x38] sm:$0xff]   ;;  %v5914_v20 = vld [vmem:[%s5889_s1 + $0x40] sm:$0xff]   ;;  %v5217_v21 = vld [vmem:[#allocation5 + $0x88] sm:$0xff]   ;;  %p6197_p9 = scmp.ne.s32.totalorder %s6195_s13, 0  ;;  %p5518_p3 = scmp.lt.s32.totalorder %s5516_s28, %s5510_s24 }
  0xca   : > { %886 = vmatprep.mubr.bf16.mxu1 %v5909_v12  ;;  %v5218_v22 = vld [vmem:[%s5889_s1 + $0x10] sm:$0xff]   ;;  %v5221_v26 = vld [vmem:[#allocation5 + $0x98] sm:$0xff]   ;;  %v5226_v29 = vld [vmem:[%s5889_s1 + $0x20] sm:$0xff]  }
  0xcb   : > { %v5918_v23 = vld [vmem:[%s5889_s1 + $0x50] sm:$0xff]   ;;  %v5223_v27 = vld [vmem:[%s5889_s1 + $0x58] sm:$0xff]   ;;  %v5227_v31 = vld [vmem:[%s5889_s1 + $0x60] sm:$0xff]   ;;  %p5512_p10 = pnand %p5511_p8, %p6197_p9  ;;  %p5519_p2 = por %p5518_p3, %p5517_p4 }
  0xcc   : > { %4785 = vmatpush3.bf16.msra.mxu0 %v5201_v5  ;;  %5026 = vmatpush3.bf16.msra.mxu1 %v5201_v5  ;;  %v5220_v24 = vld [vmem:[#allocation5 + $0x90] sm:$0xff]   ;;  %v5224_v28 = vld [vmem:[#allocation5 + $0xa0] sm:$0xff]   ;;  %v5225_v30 = vld [vmem:[#allocation5 + $0xa8] sm:$0xff]  }
  0xcd   : > { %4786 = vmatprep.subr.bf16.mxu0 %v5202_v6  ;;  %5019 = vmatprep.subr.bf16.mxu1 %v5202_v6  ;;  %v5228_v32 = vld [vmem:[#allocation5 + $0xb0] sm:$0xff]   ;;  %v5230_v33 = vld [vmem:[%s5889_s1 + $0x28] sm:$0xff]   ;;  %v5232_v41 = vld [vmem:[%s5889_s1 + $0x38] sm:$0xff]   ;;  %p5513_p1 = pneg %p5512_p10 }
  0xce   : > { %v5229_v34 = vld [vmem:[#allocation5 + $0xb8] sm:$0xff]   ;;  %v5236_v35 = vld [vmem:[#allocation7 + $0x4] ss:$8 sps:$4 sm:$0xff]   ;;  %v5234_v37 = vld [vmem:[#allocation7] ss:$8 sps:$4 sm:$0xff]  }
  0xcf   : > { %v5231_v36 = vld [vmem:[%s5889_s1 + $0x30] sm:$0xff]   ;;  %v5233_v43 = vld [vmem:[%s5889_s1 + $0x68] sm:$0xff]   ;;  %s6095_s1 = scalar_lea.hbm %s6196_s18, %s4779_s30  ;;  %p5520_p5 = pnand %p5519_p2, %p5513_p1 }
  0xd0   : > { %4787 = vmatpush3.bf16.msra.mxu0 %v5203_v7  ;;  %5027 = vmatpush3.bf16.msra.mxu1 %v5203_v7  ;;  %v5239_v38 = vld [vmem:[#allocation7 + $0x14] ss:$8 sps:$4 sm:$0xff]   ;;  %v5237_v39 = vld [vmem:[#allocation7 + $0x10] ss:$8 sps:$4 sm:$0xff]   ;;  %v5242_v40 = vld [vmem:[#allocation7 + $0x24] ss:$8 sps:$4 sm:$0xff]  }
  0xd1   : > { %4788 = vmatprep.subr.bf16.mxu0 %v5204_v8  ;;  %5020 = vmatprep.subr.bf16.mxu1 %v5204_v8  ;;  %v5240_v42 = vld [vmem:[#allocation7 + $0x20] ss:$8 sps:$4 sm:$0xff]   ;;  %v5245_v44 = vld [vmem:[#allocation7 + $0x34] ss:$8 sps:$4 sm:$0xff]   ;;  %v5243_v45 = vld [vmem:[#allocation7 + $0x30] ss:$8 sps:$4 sm:$0xff]  }
  0xd2   : > { %v5248_v46 = vld [vmem:[#allocation7 + $0x44] ss:$8 sps:$4 sm:$0xff]   ;;  %v5246_v47 = vld [vmem:[#allocation7 + $0x40] ss:$8 sps:$4 sm:$0xff]   ;;  %v5251_v48 = vld [vmem:[#allocation7 + $0x54] ss:$8 sps:$4 sm:$0xff]  }
  0xd3   : > { %v5249_v49 = vld [vmem:[#allocation7 + $0x50] ss:$8 sps:$4 sm:$0xff]   ;;  %v5254_v50 = vld [vmem:[#allocation7 + $0x64] ss:$8 sps:$4 sm:$0xff]   ;;  %v5252_v51 = vld [vmem:[#allocation7 + $0x60] ss:$8 sps:$4 sm:$0xff]  }
  0xd4   : > { %4789 = vmatpush3.bf16.msra.mxu0 %v5205_v9  ;;  %5028 = vmatpush3.bf16.msra.mxu1 %v5205_v9  ;;  %v5257_v52 = vld [vmem:[#allocation7 + $0x74] ss:$8 sps:$4 sm:$0xff]   ;;  %v5255_v53 = vld [vmem:[#allocation7 + $0x70] ss:$8 sps:$4 sm:$0xff]   ;;  %v5260_v54 = vld [vmem:[#allocation7 + $0x84] ss:$8 sps:$4 sm:$0xff]  }
  0xd5   : > { %4790 = vmatprep.subr.bf16.mxu0 %v5206_v10  ;;  %5021 = vmatprep.subr.bf16.mxu1 %v5206_v10  ;;  %v5258_v55 = vld [vmem:[#allocation7 + $0x80] ss:$8 sps:$4 sm:$0xff]   ;;  %v5263_v56 = vld [vmem:[#allocation7 + $0x94] ss:$8 sps:$4 sm:$0xff]   ;;  %v5261_v57 = vld [vmem:[#allocation7 + $0x90] ss:$8 sps:$4 sm:$0xff]  }
  0xd6   : > { %v5266_v58 = vld [vmem:[#allocation7 + $0xa4] ss:$8 sps:$4 sm:$0xff]   ;;  %v5264_v59 = vld [vmem:[#allocation7 + $0xa0] ss:$8 sps:$4 sm:$0xff]   ;;  %v5269_v60 = vld [vmem:[#allocation7 + $0xb4] ss:$8 sps:$4 sm:$0xff]  }
  0xd7   : > { %v5267_v61 = vld [vmem:[#allocation7 + $0xb0] ss:$8 sps:$4 sm:$0xff]   ;;  %v5272_v62 = vld [vmem:[#allocation7 + $0xc4] ss:$8 sps:$4 sm:$0xff]   ;;  %v5270_v63 = vld [vmem:[#allocation7 + $0xc0] ss:$8 sps:$4 sm:$0xff]  }
  0xd8   : > { %4791 = vmatpush3.bf16.msra.mxu0 %v5207_v13  ;;  %5029 = vmatpush3.bf16.msra.mxu1 %v5207_v13  ;;  %v5275_v0 = vld [vmem:[#allocation7 + $0xd4] ss:$8 sps:$4 sm:$0xff]   ;;  %v5273_v1 = vld [vmem:[#allocation7 + $0xd0] ss:$8 sps:$4 sm:$0xff]   ;;  %v5278_v2 = vld [vmem:[#allocation7 + $0xe4] ss:$8 sps:$4 sm:$0xff]  }
  0xd9   : > { %4792 = vmatprep.subr.bf16.mxu0 %v5208_v14  ;;  %5022 = vmatprep.subr.bf16.mxu1 %v5208_v14  ;;  %v5276_v3 = vld [vmem:[#allocation7 + $0xe0] ss:$8 sps:$4 sm:$0xff]   ;;  %v5281_v4 = vld [vmem:[#allocation7 + $0xf4] ss:$8 sps:$4 sm:$0xff]   ;;  %v5279_v5 = vld [vmem:[#allocation7 + $0xf0] ss:$8 sps:$4 sm:$0xff]  }
  0xda   : > { %v5284_v6 = vld [vmem:[#allocation7 + $0x104] ss:$8 sps:$4 sm:$0xff]  }
  0xdb   : > { %v1692_v7 = vld [vmem:[#allocation10] sm:$0xff] }
  0xdc   : > { %4793 = vmatpush3.bf16.msra.mxu0 %v5209_v15  ;;  %5030 = vmatpush3.bf16.msra.mxu1 %v5209_v15  ;;  %v1696_v8 = vld [vmem:[#allocation10 + $0x20] sm:$0xff] }
  0xdd   : > { %4794 = vmatprep.subr.bf16.mxu0 %v5210_v16  ;;  %5023 = vmatprep.subr.bf16.mxu1 %v5210_v16  ;;  %v4452_v9 = vcombine.low %v1692_v7, %v1696_v8  ;;  %v4453_v10 = vcombine.high %v1692_v7, %v1696_v8  ;;  %v1708_v14 = vld [vmem:[#allocation10 + $0x80] sm:$0xff] }
  0xde   : > { %v1712_v15 = vld [vmem:[#allocation10 + $0xa0] sm:$0xff] }
  0xe0   : > { %4795 = vmatpush3.bf16.msra.mxu0 %v5211_v17  ;;  %5031 = vmatpush3.bf16.msra.mxu1 %v5211_v17  ;;  %v4469_v17 = vcombine.high %v1708_v14, %v1712_v15 }
  0xe1   : > { %4976 = vmatprep.subr.bf16.mxu1 %v5216_v19  ;;  %2460 = vmatprep.subr.bf16.mxu0 %v4453_v10 }
  0xe3   : > { %823 = vmatmul.mubr.bf16.vlgmr.msra.gmra.mrb[0].mxu0 %v5214_v18  ;;  %887 = vmatmul.mubr.bf16.vlgmr.msra.gmra.mrb[0].mxu1 %v5914_v20  ;;  %v1716_v18 = vld [vmem:[#allocation10 + $0xc0] sm:$0xff] }
  0xe4   : > { %4977 = vmatpush3.bf16.msra.mxu1 %v5216_v19  ;;  %830 = vmatprep.mubr.bf16.mxu0 %v5218_v22  ;;  %v1720_v19 = vld [vmem:[#allocation10 + $0xe0] sm:$0xff] }
  0xe5   : > { %4978 = vmatprep.subr.bf16.mxu1 %v5217_v21  ;;  %894 = vmatprep.mubr.bf16.mxu1 %v5918_v23 }
  0xe6   : > { %2461 = vmatpush1.bf16.msra.mxu0 %v4452_v9 }
  0xe8   : > { %4979 = vmatpush3.bf16.msra.mxu1 %v5217_v21  ;;  %v4477_v21 = vcombine.high %v1716_v18, %v1720_v19 }
  0xe9   : > { %4980 = vmatprep.subr.bf16.mxu1 %v5220_v24 }
  0xeb   : > { %831 = vmatmul.mubr.bf16.gmra.mrb[4].mxu0 %v5212_v11  ;;  %895 = vmatmul.mubr.bf16.gmra.mrb[4].mxu1 %v5909_v12  ;;  %v1700_v11 = vld [vmem:[#allocation10 + $0x40] sm:$0xff] }
  0xec   : > { %4981 = vmatpush3.bf16.msra.mxu1 %v5220_v24  ;;  %838 = vmatprep.mubr.bf16.mxu0 %v5222_v25  ;;  %v4476_v24 = vcombine.low %v1716_v18, %v1720_v19  ;;  %v5955_v19 = vld [vmem:[%s6140_s2] ss:$0 sm:$0xff] }
  0xed   : > { %4982 = vmatprep.subr.bf16.mxu1 %v5221_v26  ;;  %902 = vmatprep.mubr.bf16.mxu1 %v5223_v27 }
  0xf0   : > { %4983 = vmatpush3.bf16.msra.mxu1 %v5221_v26  ;;  %v1732_v26 = vld [vmem:[#allocation10 + $0x140] sm:$0xff] }
  0xf1   : > { %4984 = vmatprep.subr.bf16.mxu1 %v5224_v28 }
  0xf3   : > { %839 = vmatmul.mubr.bf16.gmra.mrb[8].mxu0 %v5218_v22  ;;  %903 = vmatmul.mubr.bf16.gmra.mrb[8].mxu1 %v5918_v23 }
  0xf4   : > { %4985 = vmatpush3.bf16.msra.mxu1 %v5224_v28  ;;  %846 = vmatprep.mubr.bf16.mxu0 %v5226_v29 }
  0xf5   : > { %4986 = vmatprep.subr.bf16.mxu1 %v5225_v30  ;;  %910 = vmatprep.mubr.bf16.mxu1 %v5227_v31 }
  0xf8   : > { %4987 = vmatpush3.bf16.msra.mxu1 %v5225_v30 }
  0xf9   : > { %4988 = vmatprep.subr.bf16.mxu1 %v5228_v32 }
  0xfb   : > { %847 = vmatmul.mubr.bf16.gmra.mrb[12].mxu0 %v5222_v25  ;;  %911 = vmatmul.mubr.bf16.gmra.mrb[12].mxu1 %v5223_v27 }
  0xfc   : > { %4989 = vmatpush3.bf16.msra.mxu1 %v5228_v32  ;;  %854 = vmatprep.mubr.bf16.mxu0 %v5230_v33 }
  0xfd   : > { %4990 = vmatprep.subr.bf16.mxu1 %v5229_v34  ;;  %4992 = vmatprep.mubr.bf16.mxu1 %v5218_v22  ;;  %v1724_v22 = vld [vmem:[#allocation10 + $0x100] sm:$0xff] }
 0x100   : > { %4991 = vmatpush3.bf16.msra.mxu1 %v5229_v34 }
 0x101   : > { %1390 = vmatprep.subr.bf16.mxu1 %v5236_v35 }
 0x103   : > { %855 = vmatmul.mubr.bf16.gmra.mrb[16].mxu0 %v5226_v29  ;;  %4993 = vmatmul.mubr.bf16.vlgmr.msra.gmra.mrb[16].mxu1 %v5222_v25 }
 0x104   : > { %862 = vmatprep.mubr.bf16.mxu0 %v5231_v36  ;;  %4996 = vmatprep.mubr.bf16.mxu1 %v5226_v29 }
 0x105   : > { %1391 = vmatpush1.bf16.msra.mxu1 %v5234_v37 }
 0x106   : > { %1392 = vmatprep.subr.bf16.mxu1 %v5239_v38 }
 0x109   : > { %1393 = vmatpush1.bf16.msra.mxu1 %v5237_v39 }
 0x10a   : > { %1394 = vmatprep.subr.bf16.mxu1 %v5242_v40  ;;  %v1740_v40 = vld [vmem:[#allocation10 + $0x180] sm:$0xff] }
 0x10b   : > { %863 = vmatmul.mubr.bf16.gmra.mrb[20].mxu0 %v5230_v33  ;;  %4997 = vmatmul.mubr.bf16.gmra.mrb[20].mxu1 %v5230_v33 }
 0x10c   : > { %870 = vmatprep.mubr.bf16.mxu0 %v5232_v41  ;;  %5000 = vmatprep.mubr.bf16.mxu1 %v5231_v36 }
 0x10d   : > { %1395 = vmatpush1.bf16.msra.mxu1 %v5240_v42 }
 0x10e   : > { %1396 = vmatprep.subr.bf16.mxu1 %v5245_v44 }
 0x111   : > { %1397 = vmatpush1.bf16.msra.mxu1 %v5243_v45 }
 0x112   : > { %1398 = vmatprep.subr.bf16.mxu1 %v5248_v46 }
 0x113   : > { %871 = vmatmul.mubr.bf16.gmra.mrb[24].mxu0 %v5231_v36  ;;  %5001 = vmatmul.mubr.bf16.gmra.mrb[24].mxu1 %v5232_v41 }
 0x114   : > { %878 = vmatprep.mubr.bf16.mxu0 %v5914_v20  ;;  %5004 = vmatprep.mubr.bf16.mxu1 %v5914_v20  ;;  %v4468_v20 = vcombine.low %v1708_v14, %v1712_v15 }
 0x115   : > { %1399 = vmatpush1.bf16.msra.mxu1 %v5246_v47 }
 0x116   : > { %1400 = vmatprep.subr.bf16.mxu1 %v5251_v48 }
 0x119   : > { %1401 = vmatpush1.bf16.msra.mxu1 %v5249_v49 }
 0x11a   : > { %1402 = vmatprep.subr.bf16.mxu1 %v5254_v50 }
 0x11b   : > { %879 = vmatmul.mubr.bf16.gmra.mrb[28].mxu0 %v5232_v41  ;;  %5005 = vmatmul.mubr.bf16.gmra.mrb[28].mxu1 %v5909_v12  ;;  %v1704_v12 = vld [vmem:[#allocation10 + $0x60] sm:$0xff] }
 0x11c   : > { %5008 = vmatprep.mubr.bf16.mxu1 %v5918_v23  ;;  %v4461_v13 = vcombine.high %v1700_v11, %v1704_v12  ;;  %v4460_v16 = vcombine.low %v1700_v11, %v1704_v12  ;;  %v1728_v23 = vld [vmem:[#allocation10 + $0x120] sm:$0xff] }
 0x11d   : > { %1403 = vmatpush1.bf16.msra.mxu1 %v5252_v51  ;;  %v4485_v25 = vcombine.high %v1724_v22, %v1728_v23  ;;  %v4484_v32 = vcombine.low %v1724_v22, %v1728_v23  ;;  %v1744_v41 = vld [vmem:[#allocation10 + $0x1a0] sm:$0xff] }
 0x11e   : > { %1404 = vmatprep.subr.bf16.mxu1 %v5257_v52  ;;  %2462 = vmatprep.subr.bf16.mxu0 %v4461_v13  ;;  %v4501_v45 = vcombine.high %v1740_v40, %v1744_v41  ;;  %v4500_v50 = vcombine.low %v1740_v40, %v1744_v41 }
 0x11f   : > { %2463 = vmatpush1.bf16.msra.mxu0 %v4460_v16 }
 0x120   : > { %2464 = vmatprep.subr.bf16.mxu0 %v4469_v17 }
 0x121   : > { %1405 = vmatpush1.bf16.msra.mxu1 %v5255_v53 }
 0x122   : > { %1406 = vmatprep.subr.bf16.mxu1 %v5260_v54 }
 0x123   : > { %5009 = vmatmul.mubr.bf16.gmra.mrb[32].mxu1 %v5223_v27  ;;  %2465 = vmatpush1.bf16.msra.mxu0 %v4468_v20  ;;  %v1736_v27 = vld [vmem:[#allocation10 + $0x160] sm:$0xff] }
 0x124   : > { %5012 = vmatprep.mubr.bf16.mxu1 %v5227_v31  ;;  %2466 = vmatprep.subr.bf16.mxu0 %v4477_v21  ;;  %v4493_v37 = vcombine.high %v1732_v26, %v1736_v27  ;;  %v4492_v44 = vcombine.low %v1732_v26, %v1736_v27 }
 0x125   : > { %1407 = vmatpush1.bf16.msra.mxu1 %v5258_v55 }
 0x126   : > { %1408 = vmatprep.subr.bf16.mxu1 %v5263_v56 }
 0x127   : > { %2467 = vmatpush1.bf16.msra.mxu0 %v4476_v24 }
 0x128   : > { %2468 = vmatprep.subr.bf16.mxu0 %v4485_v25 }
 0x129   : > { %1409 = vmatpush1.bf16.msra.mxu1 %v5261_v57 }
 0x12a   : > { %1410 = vmatprep.subr.bf16.mxu1 %v5266_v58 }
 0x12b   : > { %5013 = vmatmul.mubr.bf16.gmra.mrb[36].mxu1 %v5233_v43  ;;  %2469 = vmatpush1.bf16.msra.mxu0 %v4484_v32 }
 0x12c   : > { %2470 = vmatprep.subr.bf16.mxu0 %v4493_v37 }
 0x12d   : > { %1411 = vmatpush1.bf16.msra.mxu1 %v5264_v59 }
 0x12e   : > { %1412 = vmatprep.subr.bf16.mxu1 %v5269_v60 }
 0x12f   : > { %2471 = vmatpush1.bf16.msra.mxu0 %v4492_v44 }
 0x130   : > { %2472 = vmatprep.subr.bf16.mxu0 %v4501_v45 }
 0x131   : > { %1413 = vmatpush1.bf16.msra.mxu1 %v5267_v61 }
 0x132   : > { %1414 = vmatprep.subr.bf16.mxu1 %v5272_v62 }
 0x133   : > { %2473 = vmatpush1.bf16.msra.mxu0 %v4500_v50 }
 0x135   : > { %1415 = vmatpush1.bf16.msra.mxu1 %v5270_v63 }
 0x136   : > { %1416 = vmatprep.subr.bf16.mxu1 %v5275_v0 }
 0x139   : > { %1417 = vmatpush1.bf16.msra.mxu1 %v5273_v1 }
 0x13a   : > { %1418 = vmatprep.subr.bf16.mxu1 %v5278_v2 }
 0x13d   : > { %1419 = vmatpush1.bf16.msra.mxu1 %v5276_v3 }
 0x13e   : > { %1420 = vmatprep.subr.bf16.mxu1 %v5281_v4 }
 0x141   : > { %1421 = vmatpush1.bf16.msra.mxu1 %v5279_v5 }
 0x142   : > { %1463 = vmatprep.subr.bf16.mxu1 %v5284_v6 }
 0x1b6   : > { %v4796_v28 = vpop.f32.mrb[0].mxu0  ;;  %v4844_v29 = vpop.f32.mrb[0].mxu1 }
 0x1b7   : > { %v4797_v30 = vpop.f32.mrb[1].mxu0  ;;  %v4845_v31 = vpop.f32.mrb[1].mxu1 }
 0x1b8   : > { %v4798_v33 = vadd.f32 %v4797_v30, %v4796_v28  ;;  %v4799_v34 = vpop.f32.mrb[2].mxu0  ;;  %v5936_v35 = vadd.f32 %v4845_v31, %v4844_v29  ;;  %v4847_v36 = vpop.f32.mrb[2].mxu1 }
 0x1b9   : > { %v4800_v38 = vpop.f32.mrb[3].mxu0  ;;  %v4848_v39 = vpop.f32.mrb[3].mxu1 }
 0x1ba   : > { %v4801_v42 = vadd.f32 %v4800_v38, %v4799_v34  ;;  %v5938_v43 = vadd.f32 %v4848_v39, %v4847_v36  ;;  %v825_v23 = vadd.f32 %v4798_v33, %v5955_v19 }
 0x1bc   : > { %v828_v32 = vadd.f32 %v4801_v42, %v5955_v19 }
 0x1be   : > { %v4802_v46 = vpop.f32.mrb[4].mxu0  ;;  %v4850_v47 = vpop.f32.mrb[4].mxu1 }
 0x1bf   : > { %v4803_v48 = vpop.f32.mrb[5].mxu0  ;;  %v4851_v49 = vpop.f32.mrb[5].mxu1 }
 0x1c0   : > { %v4804_v51 = vadd.f32 %v4803_v48, %v4802_v46  ;;  %v4805_v52 = vpop.f32.mrb[6].mxu0  ;;  %v5940_v53 = vadd.f32 %v4851_v49, %v4850_v47  ;;  %v4853_v54 = vpop.f32.mrb[6].mxu1 }
 0x1c1   : > { %v4806_v55 = vpop.f32.mrb[7].mxu0  ;;  %v4854_v56 = vpop.f32.mrb[7].mxu1 }
 0x1c2   : > { %v4807_v57 = vadd.f32 %v4806_v55, %v4805_v52  ;;  %v5942_v58 = vadd.f32 %v4854_v56, %v4853_v54  ;;  %v833_v20 = vadd.f32 %v4804_v51, %v5955_v19 }
 0x1c4   : > { %v836_v27 = vadd.f32 %v4807_v57, %v5955_v19 }
 0x1c6   : > { %v4808_v59 = vpop.f32.mrb[8].mxu0  ;;  %v4856_v60 = vpop.f32.mrb[8].mxu1 }
 0x1c7   : > { %v4809_v61 = vpop.f32.mrb[9].mxu0  ;;  %v4857_v62 = vpop.f32.mrb[9].mxu1 }
 0x1c8   : > { %v4810_v63 = vadd.f32 %v4809_v61, %v4808_v59  ;;  %v4811_v0 = vpop.f32.mrb[10].mxu0  ;;  %v5944_v1 = vadd.f32 %v4857_v62, %v4856_v60  ;;  %v4859_v2 = vpop.f32.mrb[10].mxu1 }
 0x1c9   : > { %v4812_v3 = vpop.f32.mrb[11].mxu0  ;;  %v4860_v4 = vpop.f32.mrb[11].mxu1 }
 0x1ca   : > { %v4813_v5 = vadd.f32 %v4812_v3, %v4811_v0  ;;  %v5946_v6 = vadd.f32 %v4860_v4, %v4859_v2  ;;  %v841_v50 = vadd.f32 %v4810_v63, %v5955_v19 }
 0x1cc   : > { %v844_v61 = vadd.f32 %v4813_v5, %v5955_v19 }
 0x1ce   : > { %v4814_v7 = vpop.f32.mrb[12].mxu0  ;;  %v4862_v8 = vpop.f32.mrb[12].mxu1 }
 0x1cf   : > { %v4815_v9 = vpop.f32.mrb[13].mxu0  ;;  %v4863_v10 = vpop.f32.mrb[13].mxu1 }
 0x1d0   : > { %v4816_v11 = vadd.f32 %v4815_v9, %v4814_v7  ;;  %v4817_v12 = vpop.f32.mrb[14].mxu0  ;;  %v5948_v13 = vadd.f32 %v4863_v10, %v4862_v8  ;;  %v4865_v14 = vpop.f32.mrb[14].mxu1 }
 0x1d1   : > { %v4818_v15 = vpop.f32.mrb[15].mxu0  ;;  %v4866_v16 = vpop.f32.mrb[15].mxu1 }
 0x1d2   : > { %v4819_v17 = vadd.f32 %v4818_v15, %v4817_v12  ;;  %v5950_v18 = vadd.f32 %v4866_v16, %v4865_v14  ;;  %v849_v46 = vadd.f32 %v4816_v11, %v5955_v19 }
 0x1d4   : > { %v852_v54 = vadd.f32 %v4819_v17, %v5955_v19 }
 0x1d6   : > { %v4820_v21 = vpop.f32.mrb[16].mxu0  ;;  %v4994_v22 = vpop.f32.mrb[16].mxu1 }
 0x1d7   : > { %v962_v24 = vadd.f32 %v4994_v22, %v833_v20  ;;  %v4821_v25 = vpop.f32.mrb[17].mxu0  ;;  %v953_v26 = vpop.f32.mrb[17].mxu1 }
 0x1d8   : > { %v4822_v28 = vadd.f32 %v4821_v25, %v4820_v21  ;;  %v954_v29 = vadd.f32 %v953_v26, %v825_v23  ;;  %v4823_v30 = vpop.f32.mrb[18].mxu0  ;;  %v4995_v31 = vpop.f32.mrb[18].mxu1 }
 0x1d9   : > { %v965_v34 = vadd.f32 %v4995_v31, %v836_v27  ;;  %v4824_v36 = vpop.f32.mrb[19].mxu0  ;;  %v956_v37 = vpop.f32.mrb[19].mxu1  ;;  %v1050_v40 = vmax.f32 %v962_v24, 0.0 }
 0x1da   : > { %v4825_v38 = vadd.f32 %v4824_v36, %v4823_v30  ;;  %v957_v39 = vadd.f32 %v956_v37, %v828_v32  ;;  %v1048_v44 = vmax.f32 %v954_v29, 0.0  ;;  %v857_v16 = vadd.f32 %v4822_v28, %v5955_v19  ;;  %v5282_v29 = vld [vmem:[#allocation7 + $0x100] ss:$8 sps:$4 sm:$0xff]  }
 0x1db   : > { %v1051_v41 = vmax.f32 %v965_v34, 0.0  ;;  %v5287_v34 = vld [vmem:[#allocation7 + $0x114] ss:$8 sps:$4 sm:$0xff]  }
 0x1dc   : > { %v1049_v33 = vmax.f32 %v957_v39, 0.0  ;;  %v860_v26 = vadd.f32 %v4825_v38, %v5955_v19 }
 0x1dd   : > { %v1073_v45 = vpack.c.bf16 %v1051_v41, %v1050_v40 }
 0x1de   : > { %v1072_v47 = vpack.c.bf16 %v1049_v33, %v1048_v44  ;;  %v4826_v48 = vpop.f32.mrb[20].mxu0  ;;  %v4998_v49 = vpop.f32.mrb[20].mxu1  ;;  %v5285_v44 = vld [vmem:[#allocation7 + $0x110] ss:$8 sps:$4 sm:$0xff]  }
 0x1df   : > { %v978_v51 = vadd.f32 %v4998_v49, %v849_v46  ;;  %v4827_v52 = vpop.f32.mrb[21].mxu0  ;;  %v969_v42 = vpop.f32.mrb[21].mxu1 }
 0x1e0   : > { %v1084_v55 = vmax.bf16 %v1073_v45, %v1072_v47  ;;  %v4828_v56 = vadd.f32 %v4827_v52, %v4826_v48  ;;  %v970_v57 = vadd.f32 %v969_v42, %v841_v50  ;;  %v4829_v59 = vpop.f32.mrb[22].mxu0  ;;  %v4999_v60 = vpop.f32.mrb[22].mxu1  ;;  %v5290_v45 = vld [vmem:[#allocation7 + $0x124] ss:$8 sps:$4 sm:$0xff]  }
 0x1e1   : > { %v981_v62 = vadd.f32 %v4999_v60, %v852_v54  ;;  %v4830_v0 = vpop.f32.mrb[23].mxu0  ;;  %v972_v2 = vpop.f32.mrb[23].mxu1  ;;  %v1054_v7 = vmax.f32 %v978_v51, 0.0 }
 0x1e2   : > { %v4831_v3 = vadd.f32 %v4830_v0, %v4829_v59  ;;  %v973_v4 = vadd.f32 %v972_v2, %v844_v61  ;;  %v1052_v63 = vmax.f32 %v970_v57, 0.0  ;;  %v865_v11 = vadd.f32 %v4828_v56, %v5955_v19  ;;  %v5288_v57 = vld [vmem:[#allocation7 + $0x120] ss:$8 sps:$4 sm:$0xff]   ;;  %v5293_v61 = vld [vmem:[#allocation7 + $0x134] ss:$8 sps:$4 sm:$0xff]  }
 0x1e3   : > { %v1055_v8 = vmax.f32 %v981_v62, 0.0 }
 0x1e4   : > { %v1053_v9 = vmax.f32 %v973_v4, 0.0  ;;  %v868_v21 = vadd.f32 %v4831_v3, %v5955_v19 }
 0x1e5   : > { %v1075_v10 = vpack.c.bf16 %v1055_v8, %v1054_v7 }
 0x1e6   : > { %v1074_v12 = vpack.c.bf16 %v1053_v9, %v1052_v63  ;;  %v4832_v14 = vpop.f32.mrb[24].mxu0  ;;  %v5002_v15 = vpop.f32.mrb[24].mxu1  ;;  %v5291_v63 = vld [vmem:[#allocation7 + $0x130] ss:$8 sps:$4 sm:$0xff]   ;;  %v897_v9 = vadd.f32 %v5940_v53, %v5955_v19  ;;  %v892_v53 = vadd.f32 %v5938_v43, %v5955_v19  ;;  %v913_v43 = vadd.f32 %v5948_v13, %v5955_v19 }
 0x1e7   : > { %v994_v17 = vadd.f32 %v5002_v15, %v865_v11  ;;  %v4833_v20 = vpop.f32.mrb[25].mxu0  ;;  %v985_v5 = vpop.f32.mrb[25].mxu1  ;;  %v889_v15 = vadd.f32 %v5936_v35, %v5955_v19  ;;  %v908_v13 = vadd.f32 %v5946_v6, %v5955_v19 }
 0x1e8   : > { %v4834_v22 = vadd.f32 %v4833_v20, %v4832_v14  ;;  %v986_v23 = vadd.f32 %v985_v5, %v857_v16  ;;  %v4835_v24 = vpop.f32.mrb[26].mxu0  ;;  %v5003_v25 = vpop.f32.mrb[26].mxu1  ;;  %v1085_v27 = vmax.bf16 %v1075_v10, %v1074_v12  ;;  %v5296_v10 = vld [vmem:[#allocation7 + $0x144] ss:$8 sps:$4 sm:$0xff]   ;;  %v900_v20 = vadd.f32 %v5942_v58, %v5955_v19 }
 0x1e9   : > { %v997_v30 = vadd.f32 %v5003_v25, %v868_v21  ;;  %v4836_v31 = vpop.f32.mrb[27].mxu0  ;;  %v988_v32 = vpop.f32.mrb[27].mxu1  ;;  %v1058_v28 = vmax.f32 %v994_v17, 0.0 }
 0x1ea   : > { %v4837_v36 = vadd.f32 %v4836_v31, %v4835_v24  ;;  %v989_v37 = vadd.f32 %v988_v32, %v860_v26  ;;  %1422 = vmatprep.mubr.bf16.mxu1 %v1085_v27  ;;  %v1056_v40 = vmax.f32 %v986_v23, 0.0  ;;  %v873_v48 = vadd.f32 %v4834_v22, %v5955_v19  ;;  %v5294_v24 = vld [vmem:[#allocation7 + $0x140] ss:$8 sps:$4 sm:$0xff]  }
 0x1eb   : > { %v1059_v39 = vmax.f32 %v997_v30, 0.0  ;;  %1423 = vmatmul.mubr.bf16.vlgmr.msra.gmra.mrb[40].mxu1 %v1084_v55 }
 0x1ec   : > { %v1057_v41 = vmax.f32 %v989_v37, 0.0  ;;  %1464 = vmatpush1.bf16.msra.mxu1 %v5282_v29  ;;  %v876_v55 = vadd.f32 %v4837_v36, %v5955_v19  ;;  %v5297_v36 = vld [vmem:[#allocation7 + $0x150] ss:$8 sps:$4 sm:$0xff]  }
 0x1ed   : > { %v1077_v33 = vpack.c.bf16 %v1059_v39, %v1058_v28  ;;  %1465 = vmatprep.subr.bf16.mxu1 %v5287_v34  ;;  %v5302_v28 = vld [vmem:[#allocation7 + $0x164] ss:$8 sps:$4 sm:$0xff]  }
 0x1ee   : > { %v1076_v38 = vpack.c.bf16 %v1057_v41, %v1056_v40  ;;  %v4838_v46 = vpop.f32.mrb[28].mxu0  ;;  %v5006_v47 = vpop.f32.mrb[28].mxu1  ;;  %v905_v41 = vadd.f32 %v5944_v1, %v5955_v19 }
 0x1ef   : > { %v4839_v49 = vpop.f32.mrb[29].mxu0  ;;  %v1001_v50 = vpop.f32.mrb[29].mxu1 }
 0x1f0   : > { %v4840_v51 = vadd.f32 %v4839_v49, %v4838_v46  ;;  %v1002_v52 = vadd.f32 %v1001_v50, %v873_v48  ;;  %v4841_v42 = vpop.f32.mrb[30].mxu0  ;;  %v5007_v54 = vpop.f32.mrb[30].mxu1  ;;  %v5971_v56 = vmax.bf16 %v1077_v33, %v1076_v38  ;;  %1466 = vmatpush1.bf16.msra.mxu1 %v5285_v44  ;;  %v5300_v48 = vld [vmem:[#allocation7 + $0x160] ss:$8 sps:$4 sm:$0xff]  }
 0x1f1   : > { %v4842_v59 = vpop.f32.mrb[31].mxu0  ;;  %v1004_v60 = vpop.f32.mrb[31].mxu1  ;;  %1467 = vmatprep.subr.bf16.mxu1 %v5290_v45  ;;  %v916_v45 = vadd.f32 %v5950_v18, %v5955_v19 }
 0x1f2   : > { %v881_v62 = vadd.f32 %v4840_v51, %v5955_v19  ;;  %v4843_v0 = vadd.f32 %v4842_v59, %v4841_v42  ;;  %v1005_v2 = vadd.f32 %v1004_v60, %v876_v55  ;;  %1432 = vmatprep.mubr.bf16.mxu1 %v5971_v56  ;;  %v1060_v4 = vmax.f32 %v1002_v52, 0.0  ;;  %v5305_v51 = vld [vmem:[#allocation7 + $0x174] ss:$8 sps:$4 sm:$0xff]   ;;  %v5303_v59 = vld [vmem:[#allocation7 + $0x170] ss:$8 sps:$4 sm:$0xff]  }
 0x1f3   : > { %1433 = vmatmul.mubr.bf16.gmra.mrb[44].mxu1 %v1085_v27  ;;  %v5299_v27 = vld [vmem:[#allocation7 + $0x154] ss:$8 sps:$4 sm:$0xff]  }
 0x1f4   : > { %v1010_v3 = vadd.f32 %v5006_v47, %v881_v62  ;;  %v884_v7 = vadd.f32 %v4843_v0, %v5955_v19  ;;  %v1061_v8 = vmax.f32 %v1005_v2, 0.0  ;;  %1468 = vmatpush1.bf16.msra.mxu1 %v5288_v57  ;;  %v1694_v52 = vld [vmem:[#allocation10 + $0x10] sm:$0xff] }
 0x1f5   : > { %1469 = vmatprep.subr.bf16.mxu1 %v5293_v61  ;;  %v1698_v42 = vld [vmem:[#allocation10 + $0x30] sm:$0xff]  ;;  %v5607_v61 = vmov 0  }
 0x1f6   : > { %v1013_v11 = vadd.f32 %v5007_v54, %v884_v7  ;;  %v1078_v12 = vpack.c.bf16 %v1061_v8, %v1060_v4  ;;  %v5010_v14 = vpop.f32.mrb[32].mxu1  ;;  %v1062_v5 = vmax.f32 %v1010_v3, 0.0  ;;  %v4457_v6 = vcombine.high %v1694_v52, %v1698_v42  ;;  %v1702_v0 = vld [vmem:[#allocation10 + $0x50] sm:$0xff] }
 0x1f7   : > { %v1026_v16 = vadd.f32 %v5010_v14, %v897_v9  ;;  %v1017_v17 = vpop.f32.mrb[33].mxu1  ;;  %v1706_v2 = vld [vmem:[#allocation10 + $0x70] sm:$0xff]  ;;  %v4456_v3 = vcombine.low %v1694_v52, %v1698_v42 }
 0x1f8   : > { %v1063_v21 = vmax.f32 %v1013_v11, 0.0  ;;  %v1018_v22 = vadd.f32 %v1017_v17, %v889_v15  ;;  %v5011_v23 = vpop.f32.mrb[34].mxu1  ;;  %1470 = vmatpush1.bf16.msra.mxu1 %v5291_v63  ;;  %v4465_v4 = vcombine.high %v1702_v0, %v1706_v2  ;;  %v1710_v7 = vld [vmem:[#allocation10 + $0x90] sm:$0xff]  ;;  %v4464_v63 = vcombine.low %v1702_v0, %v1706_v2  ;;  %v1788_v2 = vld [vmem:[#allocation10 + $0x300] sm:$0xff] }
 0x1f9   : > { %v1029_v25 = vadd.f32 %v5011_v23, %v900_v20  ;;  %v1020_v26 = vpop.f32.mrb[35].mxu1  ;;  %1471 = vmatprep.subr.bf16.mxu1 %v5296_v10  ;;  %v1066_v30 = vmax.f32 %v1026_v16, 0.0  ;;  %v1714_v8 = vld [vmem:[#allocation10 + $0xb0] sm:$0xff] }
 0x1fa   : > { %v1021_v29 = vadd.f32 %v1020_v26, %v892_v53  ;;  %v1079_v35 = vpack.c.bf16 %v1063_v21, %v1062_v5  ;;  %v1064_v32 = vmax.f32 %v1018_v22, 0.0  ;;  %v4473_v9 = vcombine.high %v1710_v7, %v1714_v8  ;;  %v1718_v10 = vld [vmem:[#allocation10 + $0xd0] sm:$0xff] }
 0x1fb   : > { %v1067_v31 = vmax.f32 %v1029_v25, 0.0  ;;  %v1722_v11 = vld [vmem:[#allocation10 + $0xf0] sm:$0xff] }
 0x1fc   : > { %v1065_v34 = vmax.f32 %v1021_v29, 0.0  ;;  %v5984_v58 = vmax.bf16 %v1079_v35, %v1078_v12  ;;  %1472 = vmatpush1.bf16.msra.mxu1 %v5294_v24  ;;  %v4472_v12 = vcombine.low %v1710_v7, %v1714_v8  ;;  %v4481_v14 = vcombine.high %v1718_v10, %v1722_v11  ;;  %v1726_v15 = vld [vmem:[#allocation10 + $0x110] sm:$0xff]  ;;  %v1752_v29 = vld [vmem:[#allocation10 + $0x1e0] sm:$0xff] }
 0x1fd   : > { %v1081_v37 = vpack.c.bf16 %v1067_v31, %v1066_v30  ;;  %1473 = vmatprep.subr.bf16.mxu1 %v5299_v27  ;;  %v1730_v16 = vld [vmem:[#allocation10 + $0x130] sm:$0xff]  ;;  %v4480_v17 = vcombine.low %v1718_v10, %v1722_v11  ;;  %v1748_v27 = vld [vmem:[#allocation10 + $0x1c0] sm:$0xff] }
 0x1fe   : > { %v1080_v39 = vpack.c.bf16 %v1065_v34, %v1064_v32  ;;  %v5014_v40 = vpop.f32.mrb[36].mxu1  ;;  %1442 = vmatprep.mubr.bf16.mxu1 %v5984_v58  ;;  %v1734_v20 = vld [vmem:[#allocation10 + $0x150] sm:$0xff]  ;;  %v4488_v21 = vcombine.low %v1726_v15, %v1730_v16  ;;  %v4509_v30 = vcombine.high %v1748_v27, %v1752_v29  ;;  %v4508_v32 = vcombine.low %v1748_v27, %v1752_v29  ;;  %v1796_v11 = vld [vmem:[#allocation10 + $0x340] sm:$0xff] }
 0x1ff   : > { %v1042_v44 = vadd.f32 %v5014_v40, %v913_v43  ;;  %v1033_v33 = vpop.f32.mrb[37].mxu1  ;;  %1443 = vmatmul.mubr.bf16.gmra.mrb[48].mxu1 %v5971_v56  ;;  %v1738_v5 = vld [vmem:[#allocation10 + $0x170] sm:$0xff]  ;;  %v1812_v27 = vld [vmem:[#allocation10 + $0x3c0] sm:$0xff] }
 0x200   : > { %v1034_v38 = vadd.f32 %v1033_v33, %v905_v41  ;;  %v5015_v46 = vpop.f32.mrb[38].mxu1  ;;  %v1088_v47 = vmax.bf16 %v1081_v37, %v1080_v39  ;;  %1474 = vmatpush1.bf16.msra.mxu1 %v5297_v36  ;;  %v4497_v22 = vcombine.high %v1734_v20, %v1738_v5  ;;  %v1742_v23 = vld [vmem:[#allocation10 + $0x190] sm:$0xff]  ;;  %v4496_v24 = vcombine.low %v1734_v20, %v1738_v5  ;;  %v1756_v36 = vld [vmem:[#allocation10 + $0x200] sm:$0xff] }
 0x201   : > { %v1045_v49 = vadd.f32 %v5015_v46, %v916_v45  ;;  %v1036_v50 = vpop.f32.mrb[39].mxu1  ;;  %1475 = vmatprep.subr.bf16.mxu1 %v5302_v28  ;;  %v1070_v54 = vmax.f32 %v1042_v44, 0.0  ;;  %v1746_v53 = vld [vmem:[#allocation10 + $0x1b0] sm:$0xff]  ;;  %2474 = vmatprep.subr.bf16.mxu0 %v4509_v30  ;;  %v1760_v37 = vld [vmem:[#allocation10 + $0x220] sm:$0xff] }
 0x202   : > { %v1037_v1 = vadd.f32 %v1036_v50, %v908_v13  ;;  %1452 = vmatprep.mubr.bf16.mxu1 %v1088_v47  ;;  %v1068_v57 = vmax.f32 %v1034_v38, 0.0  ;;  %v4505_v25 = vcombine.high %v1742_v23, %v1746_v53  ;;  %v4504_v26 = vcombine.low %v1742_v23, %v1746_v53  ;;  %v1750_v35 = vld [vmem:[#allocation10 + $0x1d0] sm:$0xff]  ;;  %2475 = vmatpush1.bf16.msra.mxu0 %v4508_v32  ;;  %v1764_v33 = vld [vmem:[#allocation10 + $0x240] sm:$0xff] }
 0x203   : > { %v1071_v55 = vmax.f32 %v1045_v49, 0.0  ;;  %v1754_v31 = vld [vmem:[#allocation10 + $0x1f0] sm:$0xff]  ;;  %v4517_v28 = vcombine.high %v1756_v36, %v1760_v37  ;;  %v4516_v40 = vcombine.low %v1756_v36, %v1760_v37  ;;  %v1768_v45 = vld [vmem:[#allocation10 + $0x260] sm:$0xff]  ;;  %v5999_v36 = vld [vmem:[#allocation10 + $0x8] sm:$0xff] }
 0x204   : > { %v1069_v18 = vmax.f32 %v1037_v1, 0.0  ;;  %1476 = vmatpush1.bf16.msra.mxu1 %v5300_v48  ;;  %v4512_v34 = vcombine.low %v1750_v35, %v1754_v31  ;;  %v1758_v43 = vld [vmem:[#allocation10 + $0x210] sm:$0xff]  ;;  %v4525_v46 = vcombine.high %v1764_v33, %v1768_v45  ;;  %v1772_v50 = vld [vmem:[#allocation10 + $0x280] sm:$0xff]  ;;  %v6001_v37 = vld [vmem:[#allocation10 + $0x28] sm:$0xff] }
 0x205   : > { %v1083_v60 = vpack.c.bf16 %v1071_v55, %v1070_v54  ;;  %1477 = vmatprep.subr.bf16.mxu1 %v5305_v51  ;;  %v1762_v39 = vld [vmem:[#allocation10 + $0x230] sm:$0xff]  ;;  %2476 = vmatprep.subr.bf16.mxu0 %v4517_v28  ;;  %v1776_v51 = vld [vmem:[#allocation10 + $0x2a0] sm:$0xff]  ;;  %v4455_v28 = vcombine.high %v5999_v36, %v6001_v37 }
 0x206   : > { %v1082_v19 = vpack.c.bf16 %v1069_v18, %v1068_v57  ;;  %v4520_v41 = vcombine.low %v1758_v43, %v1762_v39  ;;  %v4521_v44 = vcombine.high %v1758_v43, %v1762_v39  ;;  %2477 = vmatpush1.bf16.msra.mxu0 %v4516_v40  ;;  %v1766_v38 = vld [vmem:[#allocation10 + $0x250] sm:$0xff]  ;;  %v4533_v52 = vcombine.high %v1772_v50, %v1776_v51  ;;  %v1780_v18 = vld [vmem:[#allocation10 + $0x2c0] sm:$0xff] }
 0x207   : > { %1453 = vmatmul.mubr.bf16.gmra.mrb[52].mxu1 %v5984_v58  ;;  %v1770_v13 = vld [vmem:[#allocation10 + $0x270] sm:$0xff]  ;;  %2478 = vmatprep.subr.bf16.mxu0 %v4525_v46  ;;  %v4532_v54 = vcombine.low %v1772_v50, %v1776_v51  ;;  %v1804_v5 = vld [vmem:[#allocation10 + $0x380] sm:$0xff]  ;;  %v4454_v40 = vcombine.low %v5999_v36, %v6001_v37 }
 0x208   : > { %1478 = vmatpush1.bf16.msra.mxu1 %v5303_v59  ;;  %1495 = vmatprep.mubr.bf16.mxu1 %v5607_v61  ;;  %v1089_v62 = vmax.bf16 %v1083_v60, %v1082_v19  ;;  %v4528_v48 = vcombine.low %v1766_v38, %v1770_v13  ;;  %v4529_v49 = vcombine.high %v1766_v38, %v1770_v13  ;;  %v1774_v1 = vld [vmem:[#allocation10 + $0x290] sm:$0xff]  ;;  %v1784_v59 = vld [vmem:[#allocation10 + $0x2e0] sm:$0xff] }
 0x209   : > { %2546 = vmatprep.subr.bf16.mxu1 %v4457_v6  ;;  %v1778_v42 = vld [vmem:[#allocation10 + $0x2b0] sm:$0xff]  ;;  %v4541_v6 = vcombine.high %v1780_v18, %v1784_v59  ;;  %v1816_v29 = vld [vmem:[#allocation10 + $0x3e0] sm:$0xff] }
 0x20a   : > { %v4536_v55 = vcombine.low %v1774_v1, %v1778_v42  ;;  %v4537_v57 = vcombine.high %v1774_v1, %v1778_v42  ;;  %v1782_v60 = vld [vmem:[#allocation10 + $0x2d0] sm:$0xff]  ;;  %v4573_v30 = vcombine.high %v1812_v27, %v1816_v29  ;;  %v4572_v32 = vcombine.low %v1812_v27, %v1816_v29  ;;  %v1138_v46 = vld [vmem:[%s6142_s4] sm:$0x3] }
 0x20b   : > { %v1786_v19 = vld [vmem:[#allocation10 + $0x2f0] sm:$0xff] }
 0x20c   : > { %v4545_v0 = vcombine.high %v1782_v60, %v1786_v19  ;;  %v1794_v8 = vld [vmem:[#allocation10 + $0x330] sm:$0xff] }
 0x20d   : > { %v1810_v53 = vld [vmem:[#allocation10 + $0x3b0] sm:$0xff] }
 0x20e   : > { %v6003_v43 = vld [vmem:[#allocation8 + $0x10] sm:$0xff] }
 0x20f   : > { %1496 = vmatmul.mubr.bf16.vlgmr.msra.gmra.mrb[40].mxu1 %v5971_v56  ;;  %v4489_v56 = vcombine.high %v1726_v15, %v1730_v16  ;;  %v1802_v16 = vld [vmem:[#allocation10 + $0x370] sm:$0xff] }
 0x210   : > { %1505 = vmatprep.mubr.bf16.mxu1 %v5607_v61  ;;  %2547 = vmatpush1.bf16.msra.mxu1 %v4456_v3  ;;  %v1792_v3 = vld [vmem:[#allocation10 + $0x320] sm:$0xff]  ;;  %v6007_v39 = vld [vmem:[#allocation8 + $0x30] sm:$0xff] }
 0x211   : > { %2548 = vmatprep.subr.bf16.mxu1 %v4465_v4  ;;  %v1790_v4 = vld [vmem:[#allocation10 + $0x310] sm:$0xff]  ;;  %v4549_v7 = vcombine.high %v1788_v2, %v1792_v3 }
 0x212   : > { %v4553_v10 = vcombine.high %v1790_v4, %v1794_v8 }
 0x214   : > { %2549 = vmatpush1.bf16.msra.mxu1 %v4464_v63  ;;  %v4548_v63 = vcombine.low %v1788_v2, %v1792_v3 }
 0x215   : > { %2550 = vmatprep.subr.bf16.mxu1 %v4473_v9  ;;  %v4552_v9 = vcombine.low %v1790_v4, %v1794_v8 }
 0x217   : > { %1506 = vmatmul.mubr.bf16.gmra.mrb[44].mxu1 %v5984_v58  ;;  %v4513_v58 = vcombine.high %v1750_v35, %v1754_v31  ;;  %v1814_v35 = vld [vmem:[#allocation10 + $0x3d0] sm:$0xff] }
 0x218   : > { %1515 = vmatprep.mubr.bf16.mxu1 %v5607_v61  ;;  %2551 = vmatpush1.bf16.msra.mxu1 %v4472_v12  ;;  %v1800_v12 = vld [vmem:[#allocation10 + $0x360] sm:$0xff]  ;;  %v1818_v31 = vld [vmem:[#allocation10 + $0x3f0] sm:$0xff] }
 0x219   : > { %2552 = vmatprep.subr.bf16.mxu1 %v4481_v14  ;;  %v1798_v14 = vld [vmem:[#allocation10 + $0x350] sm:$0xff]  ;;  %v4557_v15 = vcombine.high %v1796_v11, %v1800_v12 }
 0x21a   : > { %v4561_v20 = vcombine.high %v1798_v14, %v1802_v16 }
 0x21c   : > { %2553 = vmatpush1.bf16.msra.mxu1 %v4480_v17  ;;  %v4556_v17 = vcombine.low %v1796_v11, %v1800_v12 }
 0x21d   : > { %2554 = vmatprep.subr.bf16.mxu1 %v4489_v56  ;;  %v4560_v56 = vcombine.low %v1798_v14, %v1802_v16 }
 0x21f   : > { %1516 = vmatmul.mubr.bf16.gmra.mrb[48].mxu1 %v1088_v47  ;;  %v4524_v47 = vcombine.low %v1764_v33, %v1768_v45  ;;  %v1140_v33 = vlaneseq }
 0x220   : > { %1525 = vmatprep.mubr.bf16.mxu1 %v5607_v61  ;;  %2555 = vmatpush1.bf16.msra.mxu1 %v4488_v21  ;;  %v4540_v61 = vcombine.low %v1780_v18, %v1784_v59  ;;  %v1808_v21 = vld [vmem:[#allocation10 + $0x3a0] sm:$0xff] }
 0x221   : > { %2556 = vmatprep.subr.bf16.mxu1 %v4497_v22  ;;  %2479 = vmatpush1.bf16.msra.mxu0 %v4524_v47  ;;  %v1806_v22 = vld [vmem:[#allocation10 + $0x390] sm:$0xff]  ;;  %v4565_v23 = vcombine.high %v1804_v5, %v1808_v21  ;;  %v6015_v45 = vshrl.u32 %v1140_v33, 7 }
 0x222   : > { %2480 = vmatprep.subr.bf16.mxu0 %v4533_v52 }
 0x223   : > { %v1142_v38 = vsub.s32 0, %v6015_v45  ;;  %v1146_v13 = vsub.s32 1, %v6015_v45 }
 0x224   : > { %2557 = vmatpush1.bf16.msra.mxu1 %v4496_v24  ;;  %v4564_v24 = vcombine.low %v1804_v5, %v1808_v21 }
 0x225   : > { %2558 = vmatprep.subr.bf16.mxu1 %v4505_v25  ;;  %2481 = vmatpush1.bf16.msra.mxu0 %v4532_v54  ;;  %v4568_v25 = vcombine.low %v1806_v22, %v1810_v53  ;;  %v1143_v47 = vrot.slane %v1138_v46, %v1142_v38 }
 0x226   : > { %2482 = vmatprep.subr.bf16.mxu0 %v4541_v6 }
 0x227   : > { %1526 = vmatmul.mubr.bf16.gmra.mrb[52].mxu1 %v1089_v62  ;;  %v4544_v62 = vcombine.low %v1782_v60, %v1786_v19 }
 0x228   : > { %2559 = vmatpush1.bf16.msra.mxu1 %v4504_v26  ;;  %v4569_v26 = vcombine.high %v1806_v22, %v1810_v53 }
 0x229   : > { %2560 = vmatprep.subr.bf16.mxu1 %v4513_v58  ;;  %2483 = vmatpush1.bf16.msra.mxu0 %v4540_v61  ;;  %v4577_v58 = vcombine.high %v1814_v35, %v1818_v31 }
 0x22a   : > { %2484 = vmatprep.subr.bf16.mxu0 %v4549_v7 }
 0x22c   : > { %2561 = vmatpush1.bf16.msra.mxu1 %v4512_v34  ;;  %v4576_v34 = vcombine.low %v1814_v35, %v1818_v31 }
 0x22d   : > { %2562 = vmatprep.subr.bf16.mxu1 %v4521_v44  ;;  %2485 = vmatpush1.bf16.msra.mxu0 %v4548_v63  ;;  %v4585_v44 = vcombine.high %v6003_v43, %v6007_v39 }
 0x22e   : > { %2486 = vmatprep.subr.bf16.mxu0 %v4557_v15 }
 0x230   : > { %2563 = vmatpush1.bf16.msra.mxu1 %v4520_v41  ;;  %v4584_v41 = vcombine.low %v6003_v43, %v6007_v39 }
 0x231   : > { %2564 = vmatprep.subr.bf16.mxu1 %v4529_v49  ;;  %2487 = vmatpush1.bf16.msra.mxu0 %v4556_v17 }
 0x232   : > { %2488 = vmatprep.subr.bf16.mxu0 %v4565_v23 }
 0x234   : > { %2565 = vmatpush1.bf16.msra.mxu1 %v4528_v48  ;;  %v1147_v48 = vrot.slane %v1138_v46, %v1146_v13 }
 0x235   : > { %2566 = vmatprep.subr.bf16.mxu1 %v4537_v57  ;;  %2489 = vmatpush1.bf16.msra.mxu0 %v4564_v24 }
 0x236   : > { %2490 = vmatprep.subr.bf16.mxu0 %v4573_v30 }
 0x238   : > { %2567 = vmatpush1.bf16.msra.mxu1 %v4536_v55 }
 0x239   : > { %2568 = vmatprep.subr.bf16.mxu1 %v4545_v0  ;;  %2491 = vmatpush1.bf16.msra.mxu0 %v4572_v32 }
 0x23a   : > { %2503 = vmatprep.subr.bf16.mxu0 %v4455_v28 }
 0x23c   : > { %2569 = vmatpush1.bf16.msra.mxu1 %v4544_v62 }
 0x23d   : > { %2570 = vmatprep.subr.bf16.mxu1 %v4553_v10 }
 0x240   : > { %2571 = vmatpush1.bf16.msra.mxu1 %v4552_v9 }
 0x241   : > { %2572 = vmatprep.subr.bf16.mxu1 %v4561_v20 }
 0x244   : > { %2573 = vmatpush1.bf16.msra.mxu1 %v4560_v56 }
 0x245   : > { %2574 = vmatprep.subr.bf16.mxu1 %v4569_v26 }
 0x248   : > { %2575 = vmatpush1.bf16.msra.mxu1 %v4568_v25 }
 0x249   : > { %2576 = vmatprep.subr.bf16.mxu1 %v4577_v58 }
 0x24c   : > { %2577 = vmatpush1.bf16.msra.mxu1 %v4576_v34 }
 0x24d   : > { %3358 = vmatprep.subr.bf16.mxu1 %v4585_v44 }
 0x2e2   : > { %v1497_v49 = vpop.f32.mrb[40].mxu1 }
 0x2e3   : > { %v5032_v50 = vadd.f32 %v1497_v49, %v1143_v47  ;;  %v1499_v51 = vpop.f32.mrb[41].mxu1 }
 0x2e4   : > { %v5033_v1 = vadd.f32 %v1499_v51, %v1147_v48  ;;  %v1501_v52 = vpop.f32.mrb[42].mxu1 }
 0x2e5   : > { %v5034_v42 = vadd.f32 %v1501_v52, %v1143_v47  ;;  %v1503_v54 = vpop.f32.mrb[43].mxu1  ;;  %v1536_v57 = vmax.f32 %v5032_v50, 0.0 }
 0x2e6   : > { %v5035_v55 = vadd.f32 %v1503_v54, %v1147_v48  ;;  %v1537_v59 = vmax.f32 %v5033_v1, 0.0 }
 0x2e7   : > { %v1538_v18 = vmax.f32 %v5034_v42, 0.0  ;;  %v1701_v42 = vld [vmem:[#allocation10 + $0x48] sm:$0xff] }
 0x2e8   : > { %v1539_v60 = vmax.f32 %v5035_v55, 0.0  ;;  %v1705_v55 = vld [vmem:[#allocation10 + $0x68] sm:$0xff] }
 0x2e9   : > { %v1552_v6 = vpack.c.bf16 %v1538_v18, %v1536_v57  ;;  %v1574_v57 = vld [vmem:[#allocation8 + $0x50] sm:$0xff] }
 0x2ea   : > { %v1553_v19 = vpack.c.bf16 %v1539_v60, %v1537_v59  ;;  %v1507_v61 = vpop.f32.mrb[44].mxu1  ;;  %v1578_v18 = vld [vmem:[#allocation8 + $0x70] sm:$0xff]  ;;  %v1709_v60 = vld [vmem:[#allocation10 + $0x88] sm:$0xff] }
 0x2eb   : > { %v5036_v62 = vadd.f32 %v1507_v61, %v1143_v47  ;;  %v1509_v0 = vpop.f32.mrb[45].mxu1  ;;  %v1586_v61 = vld [vmem:[#allocation8 + $0xb0] sm:$0xff] }
 0x2ec   : > { %v5037_v2 = vadd.f32 %v1509_v0, %v1147_v48  ;;  %v1511_v3 = vpop.f32.mrb[46].mxu1  ;;  %v4592_v0 = vcombine.low %v1574_v57, %v1578_v18 }
 0x2ed   : > { %v5038_v4 = vadd.f32 %v1511_v3, %v1143_v47  ;;  %v1513_v7 = vpop.f32.mrb[47].mxu1  ;;  %v1540_v63 = vmax.f32 %v5036_v62, 0.0  ;;  %v4462_v62 = vcombine.low %v1701_v42, %v1705_v55 }
 0x2ee   : > { %v5039_v8 = vadd.f32 %v1513_v7, %v1147_v48  ;;  %v1541_v10 = vmax.f32 %v5037_v2, 0.0  ;;  %v1721_v7 = vld [vmem:[#allocation10 + $0xe8] sm:$0xff] }
 0x2ef   : > { %v1542_v9 = vmax.f32 %v5038_v4, 0.0  ;;  %v1717_v4 = vld [vmem:[#allocation10 + $0xc8] sm:$0xff] }
 0x2f0   : > { %v1543_v11 = vmax.f32 %v5039_v8, 0.0  ;;  %v1590_v8 = vld [vmem:[#allocation8 + $0xd0] sm:$0xff]  ;;  %v4479_v43 = vcombine.high %v1717_v4, %v1721_v7 }
 0x2f1   : > { %v1554_v12 = vpack.c.bf16 %v1542_v9, %v1540_v63  ;;  %v1594_v63 = vld [vmem:[#allocation8 + $0xf0] sm:$0xff] }
 0x2f2   : > { %v1555_v14 = vpack.c.bf16 %v1543_v11, %v1541_v10  ;;  %v1517_v15 = vpop.f32.mrb[48].mxu1  ;;  %v4609_v39 = vcombine.high %v1590_v8, %v1594_v63  ;;  %v1598_v9 = vld [vmem:[#allocation8 + $0x110] sm:$0xff]  ;;  %v4478_v11 = vcombine.low %v1717_v4, %v1721_v7  ;;  %v1777_v4 = vld [vmem:[#allocation10 + $0x2a8] sm:$0xff] }
 0x2f3   : > { %v6026_v16 = vmax.bf16 %v1554_v12, %v1552_v6  ;;  %v5040_v17 = vadd.f32 %v1517_v15, %v1143_v47  ;;  %v1519_v56 = vpop.f32.mrb[49].mxu1  ;;  %v1713_v6 = vld [vmem:[#allocation10 + $0xa8] sm:$0xff]  ;;  %v1602_v10 = vld [vmem:[#allocation8 + $0x130] sm:$0xff]  ;;  %v4608_v12 = vcombine.low %v1590_v8, %v1594_v63 }
 0x2f4   : > { %v6028_v20 = vmax.bf16 %v1555_v14, %v1553_v19  ;;  %v5041_v5 = vadd.f32 %v1519_v56, %v1147_v48  ;;  %v1521_v21 = vpop.f32.mrb[50].mxu1  ;;  %v1582_v19 = vld [vmem:[#allocation8 + $0x90] sm:$0xff]  ;;  %v4471_v2 = vcombine.high %v1709_v60, %v1713_v6  ;;  %v4470_v36 = vcombine.low %v1709_v60, %v1713_v6  ;;  %v1737_v56 = vld [vmem:[#allocation10 + $0x168] sm:$0xff] }
 0x2f5   : > { %v5042_v22 = vadd.f32 %v1521_v21, %v1143_v47  ;;  %v1523_v23 = vpop.f32.mrb[51].mxu1  ;;  %v1544_v24 = vmax.f32 %v5040_v17, 0.0  ;;  %v4601_v3 = vcombine.high %v1582_v19, %v1586_v61  ;;  %v4600_v37 = vcombine.low %v1582_v19, %v1586_v61  ;;  %v1733_v17 = vld [vmem:[#allocation10 + $0x148] sm:$0xff]  ;;  %v1610_v21 = vld [vmem:[#allocation8 + $0x170] sm:$0xff] }
 0x2f6   : > { %v5043_v53 = vadd.f32 %v1523_v23, %v1147_v48  ;;  %v1545_v26 = vmax.f32 %v5041_v5, 0.0  ;;  %v4617_v15 = vcombine.high %v1598_v9, %v1602_v10  ;;  %v1606_v5 = vld [vmem:[#allocation8 + $0x150] sm:$0xff]  ;;  %v4616_v23 = vcombine.low %v1598_v9, %v1602_v10 }
 0x2f7   : > { %v1546_v25 = vmax.f32 %v5042_v22, 0.0  ;;  %v1638_v6 = vld [vmem:[#allocation8 + $0x250] sm:$0xff] }
 0x2f8   : > { %v1547_v27 = vmax.f32 %v5043_v53, 0.0  ;;  %v4495_v53 = vcombine.high %v1733_v17, %v1737_v56  ;;  %v1642_v19 = vld [vmem:[#allocation8 + $0x270] sm:$0xff] }
 0x2f9   : > { %v1556_v29 = vpack.c.bf16 %v1546_v25, %v1544_v24  ;;  %v4625_v24 = vcombine.high %v1606_v5, %v1610_v21  ;;  %v1741_v25 = vld [vmem:[#allocation10 + $0x188] sm:$0xff]  ;;  %v1646_v7 = vld [vmem:[#allocation8 + $0x290] sm:$0xff] }
 0x2fa   : > { %v1557_v35 = vpack.c.bf16 %v1547_v27, %v1545_v26  ;;  %v1527_v30 = vpop.f32.mrb[52].mxu1  ;;  %v1745_v26 = vld [vmem:[#allocation10 + $0x1a8] sm:$0xff]  ;;  %v1614_v27 = vld [vmem:[#allocation8 + $0x190] sm:$0xff] }
 0x2fb   : > { %v5044_v31 = vadd.f32 %v1527_v30, %v1143_v47  ;;  %v1529_v32 = vpop.f32.mrb[53].mxu1  ;;  %v4624_v30 = vcombine.low %v1606_v5, %v1610_v21  ;;  %v1650_v8 = vld [vmem:[#allocation8 + $0x2b0] sm:$0xff] }
 0x2fc   : > { %v5045_v34 = vadd.f32 %v1529_v32, %v1147_v48  ;;  %v1531_v58 = vpop.f32.mrb[54].mxu1  ;;  %v1658_v9 = vld [vmem:[#allocation8 + $0x2f0] sm:$0xff] }
 0x2fd   : > { %v5046_v28 = vadd.f32 %v1531_v58, %v1143_v47  ;;  %v1533_v44 = vpop.f32.mrb[55].mxu1  ;;  %v1548_v46 = vmax.f32 %v5044_v31, 0.0  ;;  %v4463_v47 = vcombine.high %v1701_v42, %v1705_v55  ;;  %v4503_v31 = vcombine.high %v1741_v25, %v1745_v26  ;;  %v1753_v58 = vld [vmem:[#allocation10 + $0x1e8] sm:$0xff]  ;;  %v1634_v42 = vld [vmem:[#allocation8 + $0x230] sm:$0xff] }
 0x2fe   : > { %v5047_v33 = vadd.f32 %v1533_v44, %v1147_v48  ;;  %v1549_v50 = vmax.f32 %v5045_v34, 0.0  ;;  %v4593_v48 = vcombine.high %v1574_v57, %v1578_v18  ;;  %v1749_v34 = vld [vmem:[#allocation10 + $0x1c8] sm:$0xff]  ;;  %v1626_v44 = vld [vmem:[#allocation8 + $0x1f0] sm:$0xff] }
 0x2ff   : > { %v1550_v49 = vmax.f32 %v5046_v28, 0.0  ;;  %v1622_v28 = vld [vmem:[#allocation8 + $0x1d0] sm:$0xff]  ;;  %v4510_v55 = vcombine.low %v1749_v34, %v1753_v58 }
 0x300   : > { %v1551_v51 = vmax.f32 %v5047_v33, 0.0  ;;  %v4502_v33 = vcombine.low %v1741_v25, %v1745_v26  ;;  %v4640_v57 = vcombine.low %v1622_v28, %v1626_v44  ;;  %v1666_v5 = vld [vmem:[#allocation8 + $0x330] sm:$0xff]  ;;  %v1801_v25 = vld [vmem:[#allocation10 + $0x368] sm:$0xff] }
 0x301   : > { %v1558_v1 = vpack.c.bf16 %v1550_v49, %v1548_v46  ;;  %v4511_v49 = vcombine.high %v1749_v34, %v1753_v58  ;;  %v1670_v26 = vld [vmem:[#allocation8 + $0x350] sm:$0xff]  ;;  %v1809_v34 = vld [vmem:[#allocation10 + $0x3a8] sm:$0xff] }
 0x302   : > { %v1559_v52 = vpack.c.bf16 %v1551_v51, %v1549_v50  ;;  %v4641_v50 = vcombine.high %v1622_v28, %v1626_v44  ;;  %v1757_v51 = vld [vmem:[#allocation10 + $0x208] sm:$0xff]  ;;  %v1678_v58 = vld [vmem:[#allocation8 + $0x390] sm:$0xff] }
 0x303   : > { %v6030_v54 = vmax.bf16 %v1558_v1, %v1556_v29  ;;  %v1618_v29 = vld [vmem:[#allocation8 + $0x1b0] sm:$0xff]  ;;  %v1761_v1 = vld [vmem:[#allocation10 + $0x228] sm:$0xff] }
 0x304   : > { %v6032_v59 = vmax.bf16 %v1559_v52, %v1557_v35  ;;  %v4494_v35 = vcombine.low %v1733_v17, %v1737_v56  ;;  %v4633_v32 = vcombine.high %v1614_v27, %v1618_v29  ;;  %v4632_v46 = vcombine.low %v1614_v27, %v1618_v29  ;;  %v1630_v52 = vld [vmem:[#allocation8 + $0x210] sm:$0xff]  ;;  %v1793_v17 = vld [vmem:[#allocation10 + $0x328] sm:$0xff] }
 0x305   : > { %v4519_v18 = vcombine.high %v1757_v51, %v1761_v1  ;;  %v4649_v60 = vcombine.high %v1630_v52, %v1634_v42  ;;  %v4518_v61 = vcombine.low %v1757_v51, %v1761_v1  ;;  %v1662_v56 = vld [vmem:[#allocation8 + $0x310] sm:$0xff]  ;;  %v1817_v51 = vld [vmem:[#allocation10 + $0x3e8] sm:$0xff] }
 0x306   : > { %2492 = vmatprep.mubr.bf16.mxu0 %v6032_v59  ;;  %2578 = vmatprep.mubr.bf16.mxu1 %v6032_v59  ;;  %v1674_v27 = vld [vmem:[#allocation8 + $0x370] sm:$0xff] }
 0x307   : > { %2493 = vmatmul.mubr.bf16.vlgmr.msra.gmra.mrb[32].mxu0 %v6030_v54  ;;  %2579 = vmatmul.mubr.bf16.vlgmr.msra.gmra.mrb[56].mxu1 %v6030_v54  ;;  %v1682_v28 = vld [vmem:[#allocation8 + $0x3b0] sm:$0xff] }
 0x308   : > { %2504 = vmatpush1.bf16.msra.mxu0 %v4454_v40  ;;  %3359 = vmatpush1.bf16.msra.mxu1 %v4584_v41  ;;  %v1725_v40 = vld [vmem:[#allocation10 + $0x108] sm:$0xff]  ;;  %v1686_v1 = vld [vmem:[#allocation8 + $0x3d0] sm:$0xff] }
 0x309   : > { %2535 = vmatprep.mubr.bf16.mxu0 %v6032_v59  ;;  %3390 = vmatprep.mubr.bf16.mxu1 %v6028_v20  ;;  %v1729_v41 = vld [vmem:[#allocation10 + $0x128] sm:$0xff] }
 0x30a   : > { %2505 = vmatprep.subr.bf16.mxu0 %v4463_v47  ;;  %3360 = vmatprep.subr.bf16.mxu1 %v4593_v48  ;;  %v4487_v14 = vcombine.high %v1725_v40, %v1729_v41  ;;  %v4486_v22 = vcombine.low %v1725_v40, %v1729_v41  ;;  %v1765_v47 = vld [vmem:[#allocation10 + $0x248] sm:$0xff]  ;;  %v1654_v41 = vld [vmem:[#allocation8 + $0x2d0] sm:$0xff] }
 0x30b   : > { %v1769_v48 = vld [vmem:[#allocation10 + $0x268] sm:$0xff] }
 0x30c   : > { %2506 = vmatpush1.bf16.msra.mxu0 %v4462_v62  ;;  %3361 = vmatpush1.bf16.msra.mxu1 %v4592_v0  ;;  %v4648_v62 = vcombine.low %v1630_v52, %v1634_v42  ;;  %v4527_v0 = vcombine.high %v1765_v47, %v1769_v48  ;;  %v4526_v63 = vcombine.low %v1765_v47, %v1769_v48  ;;  %v1785_v40 = vld [vmem:[#allocation10 + $0x2e8] sm:$0xff]  ;;  %v1690_v52 = vld [vmem:[#allocation8 + $0x3f0] sm:$0xff]  ;;  %v1699_v47 = vld [vmem:[#allocation10 + $0x38] sm:$0xff] }
 0x30d   : > { %2507 = vmatprep.subr.bf16.mxu0 %v4471_v2  ;;  %3362 = vmatprep.subr.bf16.mxu1 %v4601_v3  ;;  %v4657_v2 = vcombine.high %v1638_v6, %v1642_v19  ;;  %v1773_v3 = vld [vmem:[#allocation10 + $0x288] sm:$0xff] }
 0x30e   : > { %v4534_v10 = vcombine.low %v1773_v3, %v1777_v4 }
 0x310   : > { %2508 = vmatpush1.bf16.msra.mxu0 %v4470_v36  ;;  %3363 = vmatpush1.bf16.msra.mxu1 %v4600_v37  ;;  %v4656_v36 = vcombine.low %v1638_v6, %v1642_v19  ;;  %v4535_v37 = vcombine.high %v1773_v3, %v1777_v4  ;;  %v4704_v6 = vcombine.low %v1686_v1, %v1690_v52  ;;  %v1711_v3 = vld [vmem:[#allocation10 + $0x98] sm:$0xff] }
 0x311   : > { %2509 = vmatprep.subr.bf16.mxu0 %v4479_v43  ;;  %3364 = vmatprep.subr.bf16.mxu1 %v4609_v39  ;;  %v4665_v43 = vcombine.high %v1646_v7, %v1650_v8  ;;  %v1781_v39 = vld [vmem:[#allocation10 + $0x2c8] sm:$0xff]  ;;  %v1715_v4 = vld [vmem:[#allocation10 + $0xb8] sm:$0xff] }
 0x312   : > { %v4542_v21 = vcombine.low %v1781_v39, %v1785_v40 }
 0x314   : > { %2510 = vmatpush1.bf16.msra.mxu0 %v4478_v11  ;;  %3365 = vmatpush1.bf16.msra.mxu1 %v4608_v12  ;;  %v4664_v11 = vcombine.low %v1646_v7, %v1650_v8  ;;  %v4543_v12 = vcombine.high %v1781_v39, %v1785_v40  ;;  %v4475_v8 = vcombine.high %v1711_v3, %v1715_v4  ;;  %v1727_v39 = vld [vmem:[#allocation10 + $0x118] sm:$0xff] }
 0x315   : > { %2511 = vmatprep.subr.bf16.mxu0 %v4487_v14  ;;  %3366 = vmatprep.subr.bf16.mxu1 %v4617_v15  ;;  %v4673_v14 = vcombine.high %v1654_v41, %v1658_v9  ;;  %v1789_v15 = vld [vmem:[#allocation10 + $0x308] sm:$0xff]  ;;  %v1731_v40 = vld [vmem:[#allocation10 + $0x138] sm:$0xff] }
 0x316   : > { %v4550_v29 = vcombine.low %v1789_v15, %v1793_v17 }
 0x318   : > { %2512 = vmatpush1.bf16.msra.mxu0 %v4486_v22  ;;  %3367 = vmatpush1.bf16.msra.mxu1 %v4616_v23  ;;  %v4672_v22 = vcombine.low %v1654_v41, %v1658_v9  ;;  %v4551_v23 = vcombine.high %v1789_v15, %v1793_v17  ;;  %v4491_v9 = vcombine.high %v1727_v39, %v1731_v40  ;;  %v1747_v15 = vld [vmem:[#allocation10 + $0x1b8] sm:$0xff] }
 0x319   : > { %2513 = vmatprep.subr.bf16.mxu0 %v4495_v53  ;;  %3368 = vmatprep.subr.bf16.mxu1 %v4625_v24  ;;  %v4681_v53 = vcombine.high %v1662_v56, %v1666_v5  ;;  %v1797_v24 = vld [vmem:[#allocation10 + $0x348] sm:$0xff] }
 0x31a   : > { %v4558_v44 = vcombine.low %v1797_v24, %v1801_v25 }
 0x31c   : > { %2514 = vmatpush1.bf16.msra.mxu0 %v4494_v35  ;;  %3369 = vmatpush1.bf16.msra.mxu1 %v4624_v30  ;;  %v4680_v35 = vcombine.low %v1662_v56, %v1666_v5  ;;  %v4559_v30 = vcombine.high %v1797_v24, %v1801_v25  ;;  %v1751_v5 = vld [vmem:[#allocation10 + $0x1d8] sm:$0xff] }
 0x31d   : > { %2515 = vmatprep.subr.bf16.mxu0 %v4503_v31  ;;  %3370 = vmatprep.subr.bf16.mxu1 %v4633_v32  ;;  %v4689_v31 = vcombine.high %v1670_v26, %v1674_v27  ;;  %v1805_v32 = vld [vmem:[#allocation10 + $0x388] sm:$0xff]  ;;  %v1763_v24 = vld [vmem:[#allocation10 + $0x238] sm:$0xff] }
 0x31e   : > { %v4566_v42 = vcombine.low %v1805_v32, %v1809_v34 }
 0x320   : > { %2516 = vmatpush1.bf16.msra.mxu0 %v4502_v33  ;;  %3371 = vmatpush1.bf16.msra.mxu1 %v4632_v46  ;;  %v4688_v33 = vcombine.low %v1670_v26, %v1674_v27  ;;  %v4567_v46 = vcombine.high %v1805_v32, %v1809_v34  ;;  %v1767_v27 = vld [vmem:[#allocation10 + $0x258] sm:$0xff] }
 0x321   : > { %2517 = vmatprep.subr.bf16.mxu0 %v4511_v49  ;;  %3372 = vmatprep.subr.bf16.mxu1 %v4641_v50  ;;  %v4697_v49 = vcombine.high %v1678_v58, %v1682_v28  ;;  %v1813_v50 = vld [vmem:[#allocation10 + $0x3c8] sm:$0xff]  ;;  %v1779_v32 = vld [vmem:[#allocation10 + $0x2b8] sm:$0xff] }
 0x322   : > { %v4574_v48 = vcombine.low %v1813_v50, %v1817_v51 }
 0x324   : > { %2518 = vmatpush1.bf16.msra.mxu0 %v4510_v55  ;;  %3373 = vmatpush1.bf16.msra.mxu1 %v4640_v57  ;;  %v4696_v55 = vcombine.low %v1678_v58, %v1682_v28  ;;  %v4575_v57 = vcombine.high %v1813_v50, %v1817_v51  ;;  %v1783_v28 = vld [vmem:[#allocation10 + $0x2d8] sm:$0xff] }
 0x325   : > { %2519 = vmatprep.subr.bf16.mxu0 %v4519_v18  ;;  %3374 = vmatprep.subr.bf16.mxu1 %v4649_v60  ;;  %v4705_v18 = vcombine.high %v1686_v1, %v1690_v52  ;;  %v1695_v60 = vld [vmem:[#allocation10 + $0x18] sm:$0xff] }
 0x326   : > { %v4459_v19 = vcombine.high %v1695_v60, %v1699_v47  ;;  %v1795_v50 = vld [vmem:[#allocation10 + $0x338] sm:$0xff] }
 0x327   : > { %v1799_v52 = vld [vmem:[#allocation10 + $0x358] sm:$0xff] }
 0x328   : > { %2520 = vmatpush1.bf16.msra.mxu0 %v4518_v61  ;;  %3375 = vmatpush1.bf16.msra.mxu1 %v4648_v62  ;;  %v1703_v61 = vld [vmem:[#allocation10 + $0x58] sm:$0xff] }
 0x329   : > { %2521 = vmatprep.subr.bf16.mxu0 %v4527_v0  ;;  %3376 = vmatprep.subr.bf16.mxu1 %v4657_v2  ;;  %v1707_v62 = vld [vmem:[#allocation10 + $0x78] sm:$0xff]  ;;  %v4458_v0 = vcombine.low %v1695_v60, %v1699_v47 }
 0x32a   : > { %v4467_v2 = vcombine.high %v1703_v61, %v1707_v62  ;;  %v4466_v7 = vcombine.low %v1703_v61, %v1707_v62  ;;  %v1811_v60 = vld [vmem:[#allocation10 + $0x3b8] sm:$0xff] }
 0x32c   : > { %2522 = vmatpush1.bf16.msra.mxu0 %v4526_v63  ;;  %3377 = vmatpush1.bf16.msra.mxu1 %v4656_v36  ;;  %v1719_v63 = vld [vmem:[#allocation10 + $0xd8] sm:$0xff] }
 0x32d   : > { %2523 = vmatprep.subr.bf16.mxu0 %v4535_v37  ;;  %3378 = vmatprep.subr.bf16.mxu1 %v4665_v43  ;;  %v1723_v36 = vld [vmem:[#allocation10 + $0xf8] sm:$0xff]  ;;  %v4474_v37 = vcombine.low %v1711_v3, %v1715_v4 }
 0x32e   : > { %v4483_v43 = vcombine.high %v1719_v63, %v1723_v36  ;;  %v4482_v41 = vcombine.low %v1719_v63, %v1723_v36 }
 0x330   : > { %2524 = vmatpush1.bf16.msra.mxu0 %v4534_v10  ;;  %3379 = vmatpush1.bf16.msra.mxu1 %v4664_v11  ;;  %v1735_v10 = vld [vmem:[#allocation10 + $0x158] sm:$0xff] }
 0x331   : > { %2525 = vmatprep.subr.bf16.mxu0 %v4543_v12  ;;  %3380 = vmatprep.subr.bf16.mxu1 %v4673_v14  ;;  %v1739_v11 = vld [vmem:[#allocation10 + $0x178] sm:$0xff]  ;;  %v4490_v12 = vcombine.low %v1727_v39, %v1731_v40 }
 0x332   : > { %v1743_v14 = vld [vmem:[#allocation10 + $0x198] sm:$0xff]  ;;  %v4498_v17 = vcombine.low %v1735_v10, %v1739_v11 }
 0x333   : > { %v4507_v56 = vcombine.high %v1743_v14, %v1747_v15 }
 0x334   : > { %2526 = vmatpush1.bf16.msra.mxu0 %v4542_v21  ;;  %3381 = vmatpush1.bf16.msra.mxu1 %v4672_v22  ;;  %v1755_v21 = vld [vmem:[#allocation10 + $0x1f8] sm:$0xff]  ;;  %v4506_v22 = vcombine.low %v1743_v14, %v1747_v15 }
 0x335   : > { %2527 = vmatprep.subr.bf16.mxu0 %v4551_v23  ;;  %3382 = vmatprep.subr.bf16.mxu1 %v4681_v53  ;;  %v4515_v23 = vcombine.high %v1751_v5, %v1755_v21  ;;  %v1759_v53 = vld [vmem:[#allocation10 + $0x218] sm:$0xff]  ;;  %v4514_v25 = vcombine.low %v1751_v5, %v1755_v21  ;;  %v1612_v21 = vld [vmem:[#allocation8 + $0x180] sm:$0xff] }
 0x336   : > { %v4523_v26 = vcombine.high %v1759_v53, %v1763_v24 }
 0x338   : > { %2528 = vmatpush1.bf16.msra.mxu0 %v4550_v29  ;;  %3383 = vmatpush1.bf16.msra.mxu1 %v4680_v35  ;;  %v1771_v29 = vld [vmem:[#allocation10 + $0x278] sm:$0xff]  ;;  %v4522_v35 = vcombine.low %v1759_v53, %v1763_v24  ;;  %v1620_v24 = vld [vmem:[#allocation8 + $0x1c0] sm:$0xff] }
 0x339   : > { %2529 = vmatprep.subr.bf16.mxu0 %v4559_v30  ;;  %3384 = vmatprep.subr.bf16.mxu1 %v4689_v31  ;;  %v4531_v30 = vcombine.high %v1767_v27, %v1771_v29  ;;  %v1775_v31 = vld [vmem:[#allocation10 + $0x298] sm:$0xff]  ;;  %v4530_v34 = vcombine.low %v1767_v27, %v1771_v29  ;;  %v1628_v29 = vld [vmem:[#allocation8 + $0x200] sm:$0xff] }
 0x33a   : > { %v4539_v58 = vcombine.high %v1775_v31, %v1779_v32 }
 0x33c   : > { %2530 = vmatpush1.bf16.msra.mxu0 %v4558_v44  ;;  %3385 = vmatpush1.bf16.msra.mxu1 %v4688_v33  ;;  %v1787_v44 = vld [vmem:[#allocation10 + $0x2f8] sm:$0xff]  ;;  %v4538_v33 = vcombine.low %v1775_v31, %v1779_v32  ;;  %v1636_v32 = vld [vmem:[#allocation8 + $0x240] sm:$0xff] }
 0x33d   : > { %2531 = vmatprep.subr.bf16.mxu0 %v4567_v46  ;;  %3386 = vmatprep.subr.bf16.mxu1 %v4697_v49  ;;  %v4547_v46 = vcombine.high %v1783_v28, %v1787_v44  ;;  %v1791_v49 = vld [vmem:[#allocation10 + $0x318] sm:$0xff]  ;;  %v4546_v51 = vcombine.low %v1783_v28, %v1787_v44  ;;  %v1644_v44 = vld [vmem:[#allocation8 + $0x280] sm:$0xff] }
 0x33e   : > { %v4555_v1 = vcombine.high %v1791_v49, %v1795_v50 }
 0x340   : > { %2532 = vmatpush1.bf16.msra.mxu0 %v4566_v42  ;;  %3387 = vmatpush1.bf16.msra.mxu1 %v4696_v55  ;;  %v1803_v42 = vld [vmem:[#allocation10 + $0x378] sm:$0xff]  ;;  %v4554_v55 = vcombine.low %v1791_v49, %v1795_v50  ;;  %v1652_v50 = vld [vmem:[#allocation8 + $0x2c0] sm:$0xff] }
 0x341   : > { %2533 = vmatprep.subr.bf16.mxu0 %v4575_v57  ;;  %3388 = vmatprep.subr.bf16.mxu1 %v4705_v18  ;;  %v4563_v57 = vcombine.high %v1799_v52, %v1803_v42  ;;  %v1807_v18 = vld [vmem:[#allocation10 + $0x398] sm:$0xff]  ;;  %v4562_v47 = vcombine.low %v1799_v52, %v1803_v42  ;;  %v1660_v42 = vld [vmem:[#allocation8 + $0x300] sm:$0xff] }
 0x342   : > { %v4570_v61 = vcombine.low %v1807_v18, %v1811_v60 }
 0x344   : > { %2534 = vmatpush1.bf16.msra.mxu0 %v4574_v48  ;;  %3389 = vmatpush1.bf16.msra.mxu1 %v4704_v6  ;;  %v4571_v48 = vcombine.high %v1807_v18, %v1811_v60  ;;  %v1815_v6 = vld [vmem:[#allocation10 + $0x3d8] sm:$0xff]  ;;  %v1668_v60 = vld [vmem:[#allocation8 + $0x340] sm:$0xff] }
 0x345   : > { %2589 = vmatprep.subr.bf16.mxu0 %v4459_v19  ;;  %v1819_v19 = vld [vmem:[#allocation10 + $0x3f8] sm:$0xff] }
 0x346   : > { %v4579_v62 = vcombine.high %v1815_v6, %v1819_v19  ;;  %v4578_v3 = vcombine.low %v1815_v6, %v1819_v19  ;;  %v1676_v19 = vld [vmem:[#allocation8 + $0x380] sm:$0xff] }
 0x347   : > { %2536 = vmatmul.mubr.bf16.vlgmr.msra.gmra.mrb[36].mxu0 %v6030_v54  ;;  %3391 = vmatmul.mubr.bf16.vlgmr.msra.gmra.mrb[56].mxu1 %v6026_v16 }
 0x348   : > { %2590 = vmatpush1.bf16.msra.mxu0 %v4458_v0  ;;  %2621 = vmatprep.mubr.bf16.mxu0 %v6032_v59  ;;  %v4499_v59 = vcombine.high %v1735_v10, %v1739_v11  ;;  %v1564_v0 = vld [vmem:[#allocation8] sm:$0xff] }
 0x349   : > { %2591 = vmatprep.subr.bf16.mxu0 %v4467_v2  ;;  %v1568_v2 = vld [vmem:[#allocation8 + $0x20] sm:$0xff] }
 0x34a   : > { %v4581_v4 = vcombine.high %v1564_v0, %v1568_v2  ;;  %v4580_v63 = vcombine.low %v1564_v0, %v1568_v2  ;;  %v1684_v2 = vld [vmem:[#allocation8 + $0x3c0] sm:$0xff] }
 0x34c   : > { %2592 = vmatpush1.bf16.msra.mxu0 %v4466_v7  ;;  %v1572_v7 = vld [vmem:[#allocation8 + $0x40] sm:$0xff] }
 0x34d   : > { %2593 = vmatprep.subr.bf16.mxu0 %v4475_v8  ;;  %v1576_v8 = vld [vmem:[#allocation8 + $0x60] sm:$0xff] }
 0x34e   : > { %v4589_v36 = vcombine.high %v1572_v7, %v1576_v8  ;;  %v4588_v39 = vcombine.low %v1572_v7, %v1576_v8  ;;  %v1565_v8 = vld [vmem:[#allocation8 + $0x8] sm:$0xff] }
 0x350   : > { %2594 = vmatpush1.bf16.msra.mxu0 %v4474_v37  ;;  %v1580_v37 = vld [vmem:[#allocation8 + $0x80] sm:$0xff] }
 0x351   : > { %2595 = vmatprep.subr.bf16.mxu0 %v4483_v43  ;;  %v1584_v43 = vld [vmem:[#allocation8 + $0xa0] sm:$0xff] }
 0x352   : > { %v4597_v40 = vcombine.high %v1580_v37, %v1584_v43  ;;  %v4596_v10 = vcombine.low %v1580_v37, %v1584_v43  ;;  %v1573_v43 = vld [vmem:[#allocation8 + $0x48] sm:$0xff] }
 0x354   : > { %2596 = vmatpush1.bf16.msra.mxu0 %v4482_v41  ;;  %v1588_v41 = vld [vmem:[#allocation8 + $0xc0] sm:$0xff] }
 0x355   : > { %2597 = vmatprep.subr.bf16.mxu0 %v4491_v9  ;;  %v1592_v9 = vld [vmem:[#allocation8 + $0xe0] sm:$0xff] }
 0x356   : > { %v4605_v11 = vcombine.high %v1588_v41, %v1592_v9  ;;  %v4604_v14 = vcombine.low %v1588_v41, %v1592_v9  ;;  %v1581_v9 = vld [vmem:[#allocation8 + $0x88] sm:$0xff] }
 0x358   : > { %2598 = vmatpush1.bf16.msra.mxu0 %v4490_v12  ;;  %v1596_v12 = vld [vmem:[#allocation8 + $0x100] sm:$0xff] }
 0x359   : > { %2599 = vmatprep.subr.bf16.mxu0 %v4499_v59  ;;  %v1600_v59 = vld [vmem:[#allocation8 + $0x120] sm:$0xff] }
 0x35a   : > { %v4613_v15 = vcombine.high %v1596_v12, %v1600_v59 }
 0x35c   : > { %2600 = vmatpush1.bf16.msra.mxu0 %v4498_v17  ;;  %v1604_v17 = vld [vmem:[#allocation8 + $0x140] sm:$0xff] }
 0x35d   : > { %2601 = vmatprep.subr.bf16.mxu0 %v4507_v56  ;;  %v4612_v56 = vcombine.low %v1596_v12, %v1600_v59  ;;  %v5307_v12 = vld [vmem:[#allocation11] sm:$0xff]   ;;  %v5308_v59 = vld [vmem:[#allocation11 + $0x48] sm:$0xff]  }
 0x360   : > { %2602 = vmatpush1.bf16.msra.mxu0 %v4506_v22  ;;  %v1616_v22 = vld [vmem:[#allocation8 + $0x1a0] sm:$0xff] }
 0x361   : > { %2603 = vmatprep.subr.bf16.mxu0 %v4515_v23  ;;  %v4629_v53 = vcombine.high %v1612_v21, %v1616_v22 }
 0x364   : > { %2604 = vmatpush1.bf16.msra.mxu0 %v4514_v25  ;;  %v1624_v25 = vld [vmem:[#allocation8 + $0x1e0] sm:$0xff] }
 0x365   : > { %2605 = vmatprep.subr.bf16.mxu0 %v4523_v26  ;;  %v4628_v26 = vcombine.low %v1612_v21, %v1616_v22  ;;  %v4637_v27 = vcombine.high %v1620_v24, %v1624_v25 }
 0x368   : > { %2606 = vmatpush1.bf16.msra.mxu0 %v4522_v35  ;;  %v1632_v35 = vld [vmem:[#allocation8 + $0x220] sm:$0xff] }
 0x369   : > { %2607 = vmatprep.subr.bf16.mxu0 %v4531_v30  ;;  %v4636_v30 = vcombine.low %v1620_v24, %v1624_v25  ;;  %v4645_v31 = vcombine.high %v1628_v29, %v1632_v35  ;;  %v5311_v24 = vld [vmem:[#allocation11 + $0x10] sm:$0xff]   ;;  %v5312_v25 = vld [vmem:[#allocation11 + $0x58] sm:$0xff]  }
 0x36c   : > { %2608 = vmatpush1.bf16.msra.mxu0 %v4530_v34  ;;  %v1640_v34 = vld [vmem:[#allocation8 + $0x260] sm:$0xff] }
 0x36d   : > { %2609 = vmatprep.subr.bf16.mxu0 %v4539_v58  ;;  %v4644_v58 = vcombine.low %v1628_v29, %v1632_v35  ;;  %v4653_v28 = vcombine.high %v1636_v32, %v1640_v34  ;;  %v1605_v29 = vld [vmem:[#allocation8 + $0x148] sm:$0xff] }
 0x36e   : > { %v1609_v35 = vld [vmem:[#allocation8 + $0x168] sm:$0xff] }
 0x370   : > { %2610 = vmatpush1.bf16.msra.mxu0 %v4538_v33  ;;  %v1648_v33 = vld [vmem:[#allocation8 + $0x2a0] sm:$0xff] }
 0x371   : > { %2611 = vmatprep.subr.bf16.mxu0 %v4547_v46  ;;  %v4652_v46 = vcombine.low %v1636_v32, %v1640_v34  ;;  %v4661_v49 = vcombine.high %v1644_v44, %v1648_v33  ;;  %v4623_v34 = vcombine.high %v1605_v29, %v1609_v35 }
 0x374   : > { %2612 = vmatpush1.bf16.msra.mxu0 %v4546_v51  ;;  %v1656_v51 = vld [vmem:[#allocation8 + $0x2e0] sm:$0xff] }
 0x375   : > { %2613 = vmatprep.subr.bf16.mxu0 %v4555_v1  ;;  %v4660_v1 = vcombine.low %v1644_v44, %v1648_v33  ;;  %v4669_v52 = vcombine.high %v1652_v50, %v1656_v51  ;;  %v5315_v44 = vld [vmem:[#allocation11 + $0x20] sm:$0xff]   ;;  %v5316_v33 = vld [vmem:[#allocation11 + $0x68] sm:$0xff]  }
 0x378   : > { %2614 = vmatpush1.bf16.msra.mxu0 %v4554_v55  ;;  %v1664_v55 = vld [vmem:[#allocation8 + $0x320] sm:$0xff] }
 0x379   : > { %2615 = vmatprep.subr.bf16.mxu0 %v4563_v57  ;;  %v4668_v57 = vcombine.low %v1652_v50, %v1656_v51  ;;  %v4677_v18 = vcombine.high %v1660_v42, %v1664_v55  ;;  %v1621_v50 = vld [vmem:[#allocation8 + $0x1c8] sm:$0xff] }
 0x37a   : > { %v1625_v51 = vld [vmem:[#allocation8 + $0x1e8] sm:$0xff] }
 0x37c   : > { %2616 = vmatpush1.bf16.msra.mxu0 %v4562_v47  ;;  %v1672_v47 = vld [vmem:[#allocation8 + $0x360] sm:$0xff] }
 0x37d   : > { %2617 = vmatprep.subr.bf16.mxu0 %v4571_v48  ;;  %v4676_v48 = vcombine.low %v1660_v42, %v1664_v55  ;;  %v4685_v6 = vcombine.high %v1668_v60, %v1672_v47  ;;  %v1629_v42 = vld [vmem:[#allocation8 + $0x208] sm:$0xff] }
 0x37e   : > { %v1633_v55 = vld [vmem:[#allocation8 + $0x228] sm:$0xff] }
 0x380   : > { %2618 = vmatpush1.bf16.msra.mxu0 %v4570_v61  ;;  %v1680_v61 = vld [vmem:[#allocation8 + $0x3a0] sm:$0xff] }
 0x381   : > { %2619 = vmatprep.subr.bf16.mxu0 %v4579_v62  ;;  %v4684_v62 = vcombine.low %v1668_v60, %v1672_v47  ;;  %v4693_v0 = vcombine.high %v1676_v19, %v1680_v61  ;;  %v1637_v60 = vld [vmem:[#allocation8 + $0x248] sm:$0xff] }
 0x382   : > { %v1641_v47 = vld [vmem:[#allocation8 + $0x268] sm:$0xff] }
 0x384   : > { %2620 = vmatpush1.bf16.msra.mxu0 %v4578_v3  ;;  %v1688_v3 = vld [vmem:[#allocation8 + $0x3e0] sm:$0xff] }
 0x385   : > { %3272 = vmatprep.subr.bf16.mxu0 %v4581_v4  ;;  %v4692_v4 = vcombine.low %v1676_v19, %v1680_v61  ;;  %v4701_v7 = vcombine.high %v1684_v2, %v1688_v3  ;;  %v1645_v19 = vld [vmem:[#allocation8 + $0x288] sm:$0xff] }
 0x386   : > { %v1649_v61 = vld [vmem:[#allocation8 + $0x2a8] sm:$0xff] }
 0x387   : > { %2622 = vmatmul.mubr.bf16.vlgmr.msra.gmra.mrb[40].mxu0 %v6030_v54  ;;  %v1608_v54 = vld [vmem:[#allocation8 + $0x160] sm:$0xff] }
 0x388   : > { %3273 = vmatpush1.bf16.msra.mxu0 %v4580_v63  ;;  %3304 = vmatprep.mubr.bf16.mxu0 %v6028_v20  ;;  %v4621_v5 = vcombine.high %v1604_v17, %v1608_v54  ;;  %v4620_v23 = vcombine.low %v1604_v17, %v1608_v54  ;;  %v1569_v63 = vld [vmem:[#allocation8 + $0x28] sm:$0xff] }
 0x389   : > { %3274 = vmatprep.subr.bf16.mxu0 %v4589_v36  ;;  %v4700_v36 = vcombine.low %v1684_v2, %v1688_v3  ;;  %v4583_v37 = vcombine.high %v1565_v8, %v1569_v63  ;;  %v1589_v17 = vld [vmem:[#allocation8 + $0xc8] sm:$0xff] }
 0x38a   : > { %v1593_v54 = vld [vmem:[#allocation8 + $0xe8] sm:$0xff] }
 0x38b   : > { %v4607_v22 = vcombine.high %v1589_v17, %v1593_v54  ;;  %v1653_v2 = vld [vmem:[#allocation8 + $0x2c8] sm:$0xff] }
 0x38c   : > { %3275 = vmatpush1.bf16.msra.mxu0 %v4588_v39  ;;  %v1577_v39 = vld [vmem:[#allocation8 + $0x68] sm:$0xff] }
 0x38d   : > { %3276 = vmatprep.subr.bf16.mxu0 %v4597_v40  ;;  %v4582_v40 = vcombine.low %v1565_v8, %v1569_v63  ;;  %v4591_v41 = vcombine.high %v1573_v43, %v1577_v39  ;;  %v1657_v3 = vld [vmem:[#allocation8 + $0x2e8] sm:$0xff] }
 0x38e   : > { %v1661_v8 = vld [vmem:[#allocation8 + $0x308] sm:$0xff] }
 0x38f   : > { %v1665_v63 = vld [vmem:[#allocation8 + $0x328] sm:$0xff] }
 0x390   : > { %3277 = vmatpush1.bf16.msra.mxu0 %v4596_v10  ;;  %v1585_v10 = vld [vmem:[#allocation8 + $0xa8] sm:$0xff] }
 0x391   : > { %3278 = vmatprep.subr.bf16.mxu0 %v4605_v11  ;;  %v5306_v11 = vld [vmem:[#allocation11 + $0x40] sm:$0xff]   ;;  %v4598_v21 = vcombine.low %v1581_v9, %v1585_v10 }
 0x392   : > { %4888 = vmatprep.subr.bf16.mxu1 %v5306_v11 }
 0x393   : > { %4889 = vmatpush3.bf16.msra.mxu1 %v5307_v12 }
 0x394   : > { %3279 = vmatpush1.bf16.msra.mxu0 %v4604_v14  ;;  %v4590_v14 = vcombine.low %v1573_v43, %v1577_v39  ;;  %4890 = vmatprep.subr.bf16.mxu1 %v5308_v59  ;;  %v1669_v43 = vld [vmem:[#allocation8 + $0x348] sm:$0xff] }
 0x395   : > { %3280 = vmatprep.subr.bf16.mxu0 %v4613_v15  ;;  %v4599_v15 = vcombine.high %v1581_v9, %v1585_v10  ;;  %v1673_v39 = vld [vmem:[#allocation8 + $0x368] sm:$0xff] }
 0x396   : > { %v1677_v9 = vld [vmem:[#allocation8 + $0x388] sm:$0xff]  ;;  %v4686_v11 = vcombine.low %v1669_v43, %v1673_v39 }
 0x397   : > { %v1681_v10 = vld [vmem:[#allocation8 + $0x3a8] sm:$0xff] }
 0x398   : > { %3281 = vmatpush1.bf16.msra.mxu0 %v4612_v56  ;;  %v5309_v56 = vld [vmem:[#allocation11 + $0x8] sm:$0xff]   ;;  %v4695_v12 = vcombine.high %v1677_v9, %v1681_v10 }
 0x399   : > { %3282 = vmatprep.subr.bf16.mxu0 %v4621_v5  ;;  %v5310_v5 = vld [vmem:[#allocation11 + $0x50] sm:$0xff]   ;;  %4891 = vmatpush3.bf16.msra.mxu1 %v5309_v56  ;;  %v1685_v59 = vld [vmem:[#allocation8 + $0x3c8] sm:$0xff]  ;;  %v1571_v56 = vld [vmem:[#allocation8 + $0x38] sm:$0xff] }
 0x39a   : > { %4892 = vmatprep.subr.bf16.mxu1 %v5310_v5 }
 0x39c   : > { %3283 = vmatpush1.bf16.msra.mxu0 %v4620_v23  ;;  %v1597_v23 = vld [vmem:[#allocation8 + $0x108] sm:$0xff] }
 0x39d   : > { %3284 = vmatprep.subr.bf16.mxu0 %v4629_v53  ;;  %v1601_v53 = vld [vmem:[#allocation8 + $0x128] sm:$0xff]  ;;  %4893 = vmatpush3.bf16.msra.mxu1 %v5311_v24 }
 0x39e   : > { %4894 = vmatprep.subr.bf16.mxu1 %v5312_v25  ;;  %v4614_v32 = vcombine.low %v1597_v23, %v1601_v53  ;;  %v1583_v25 = vld [vmem:[#allocation8 + $0x98] sm:$0xff] }
 0x3a0   : > { %3285 = vmatpush1.bf16.msra.mxu0 %v4628_v26  ;;  %v4606_v26 = vcombine.low %v1589_v17, %v1593_v54  ;;  %v1567_v54 = vld [vmem:[#allocation8 + $0x18] sm:$0xff] }
 0x3a1   : > { %3286 = vmatprep.subr.bf16.mxu0 %v4637_v27  ;;  %v4615_v27 = vcombine.high %v1597_v23, %v1601_v53  ;;  %v1579_v23 = vld [vmem:[#allocation8 + $0x78] sm:$0xff]  ;;  %v4586_v53 = vcombine.low %v1567_v54, %v1571_v56 }
 0x3a4   : > { %3287 = vmatpush1.bf16.msra.mxu0 %v4636_v30  ;;  %v5313_v30 = vld [vmem:[#allocation11 + $0x18] sm:$0xff]  }
 0x3a5   : > { %3288 = vmatprep.subr.bf16.mxu0 %v4645_v31  ;;  %v5314_v31 = vld [vmem:[#allocation11 + $0x60] sm:$0xff]   ;;  %4895 = vmatpush3.bf16.msra.mxu1 %v5313_v30  ;;  %v1595_v30 = vld [vmem:[#allocation8 + $0xf8] sm:$0xff] }
 0x3a6   : > { %4896 = vmatprep.subr.bf16.mxu1 %v5314_v31 }
 0x3a8   : > { %3289 = vmatpush1.bf16.msra.mxu0 %v4644_v58  ;;  %v1613_v58 = vld [vmem:[#allocation8 + $0x188] sm:$0xff] }
 0x3a9   : > { %3290 = vmatprep.subr.bf16.mxu0 %v4653_v28  ;;  %v1617_v28 = vld [vmem:[#allocation8 + $0x1a8] sm:$0xff]  ;;  %4897 = vmatpush3.bf16.msra.mxu1 %v5315_v44 }
 0x3aa   : > { %4898 = vmatprep.subr.bf16.mxu1 %v5316_v33  ;;  %v1607_v33 = vld [vmem:[#allocation8 + $0x158] sm:$0xff] }
 0x3ac   : > { %3291 = vmatpush1.bf16.msra.mxu0 %v4652_v46  ;;  %v4622_v46 = vcombine.low %v1605_v29, %v1609_v35  ;;  %v1591_v35 = vld [vmem:[#allocation8 + $0xd8] sm:$0xff] }
 0x3ad   : > { %3292 = vmatprep.subr.bf16.mxu0 %v4661_v49  ;;  %v4631_v49 = vcombine.high %v1613_v58, %v1617_v28 }
 0x3b0   : > { %3293 = vmatpush1.bf16.msra.mxu0 %v4660_v1  ;;  %v4630_v1 = vcombine.low %v1613_v58, %v1617_v28  ;;  %v1603_v58 = vld [vmem:[#allocation8 + $0x138] sm:$0xff]  ;;  %v4610_v28 = vcombine.low %v1591_v35, %v1595_v30 }
 0x3b1   : > { %3294 = vmatprep.subr.bf16.mxu0 %v4669_v52  ;;  %v4639_v52 = vcombine.high %v1621_v50, %v1625_v51 }
 0x3b4   : > { %3295 = vmatpush1.bf16.msra.mxu0 %v4668_v57  ;;  %v4638_v57 = vcombine.low %v1621_v50, %v1625_v51  ;;  %v6059_v50 = vld [vmem:[%s6145_s7] sm:$0xff]  ;;  %v3468_v51 = vsub.s32 5, %v6015_v45 }
 0x3b5   : > { %3296 = vmatprep.subr.bf16.mxu0 %v4677_v18  ;;  %v4647_v18 = vcombine.high %v1629_v42, %v1633_v55 }
 0x3b8   : > { %3297 = vmatpush1.bf16.msra.mxu0 %v4676_v48  ;;  %v4646_v48 = vcombine.low %v1629_v42, %v1633_v55  ;;  %v1619_v42 = vld [vmem:[#allocation8 + $0x1b8] sm:$0xff] }
 0x3b9   : > { %3298 = vmatprep.subr.bf16.mxu0 %v4685_v6  ;;  %v4655_v6 = vcombine.high %v1637_v60, %v1641_v47 }
 0x3bc   : > { %3299 = vmatpush1.bf16.msra.mxu0 %v4684_v62  ;;  %v4654_v62 = vcombine.low %v1637_v60, %v1641_v47  ;;  %v5317_v60 = vld [vmem:[#allocation11 + $0x28] sm:$0xff]  }
 0x3bd   : > { %3300 = vmatprep.subr.bf16.mxu0 %v4693_v0  ;;  %v4663_v0 = vcombine.high %v1645_v19, %v1649_v61  ;;  %4899 = vmatpush3.bf16.msra.mxu1 %v5317_v60  ;;  %v3453_v60 = vrot.slane %v6059_v50, %v1146_v13  ;;  %v5325_v13 = vld [vmem:[#allocation11 + $0x88] sm:$0xff]  }
 0x3c0   : > { %3301 = vmatpush1.bf16.msra.mxu0 %v4692_v4  ;;  %v4662_v4 = vcombine.low %v1645_v19, %v1649_v61  ;;  %v1627_v19 = vld [vmem:[#allocation8 + $0x1f8] sm:$0xff] }
 0x3c1   : > { %3302 = vmatprep.subr.bf16.mxu0 %v4701_v7  ;;  %v4671_v7 = vcombine.high %v1653_v2, %v1657_v3 }
 0x3c4   : > { %3303 = vmatpush1.bf16.msra.mxu0 %v4700_v36  ;;  %v4670_v36 = vcombine.low %v1653_v2, %v1657_v3 }
 0x3c5   : > { %3315 = vmatprep.subr.bf16.mxu0 %v4583_v37  ;;  %v4679_v37 = vcombine.high %v1661_v8, %v1665_v63 }
 0x3c7   : > { %3305 = vmatmul.mubr.bf16.vlgmr.msra.gmra.mrb[32].mxu0 %v6026_v16 }
 0x3c8   : > { %3316 = vmatpush1.bf16.msra.mxu0 %v4582_v40  ;;  %3347 = vmatprep.mubr.bf16.mxu0 %v6028_v20  ;;  %v4678_v40 = vcombine.low %v1661_v8, %v1665_v63 }
 0x3c9   : > { %3317 = vmatprep.subr.bf16.mxu0 %v4591_v41  ;;  %v4687_v41 = vcombine.high %v1669_v43, %v1673_v39  ;;  %v1631_v43 = vld [vmem:[#allocation8 + $0x218] sm:$0xff] }
 0x3ca   : > { %v1635_v39 = vld [vmem:[#allocation8 + $0x238] sm:$0xff] }
 0x3cc   : > { %3318 = vmatpush1.bf16.msra.mxu0 %v4590_v14  ;;  %v1689_v14 = vld [vmem:[#allocation8 + $0x3e8] sm:$0xff] }
 0x3cd   : > { %3319 = vmatprep.subr.bf16.mxu0 %v4599_v15  ;;  %v4694_v15 = vcombine.low %v1677_v9, %v1681_v10  ;;  %v4703_v17 = vcombine.high %v1685_v59, %v1689_v14  ;;  %v4702_v5 = vcombine.low %v1685_v59, %v1689_v14  ;;  %v5320_v9 = vld [vmem:[#allocation11 + $0x78] sm:$0xff]  }
 0x3ce   : > { %v5321_v59 = vld [vmem:[#allocation11 + $0x38] sm:$0xff]  }
 0x3d0   : > { %3320 = vmatpush1.bf16.msra.mxu0 %v4598_v21  ;;  %v4587_v21 = vcombine.high %v1567_v54, %v1571_v56  ;;  %v1639_v54 = vld [vmem:[#allocation8 + $0x258] sm:$0xff] }
 0x3d1   : > { %3321 = vmatprep.subr.bf16.mxu0 %v4607_v22  ;;  %v1575_v22 = vld [vmem:[#allocation8 + $0x58] sm:$0xff] }
 0x3d2   : > { %v4595_v24 = vcombine.high %v1575_v22, %v1579_v23  ;;  %v1643_v56 = vld [vmem:[#allocation8 + $0x278] sm:$0xff] }
 0x3d4   : > { %3322 = vmatpush1.bf16.msra.mxu0 %v4606_v26  ;;  %v1587_v26 = vld [vmem:[#allocation8 + $0xb8] sm:$0xff] }
 0x3d5   : > { %3323 = vmatprep.subr.bf16.mxu0 %v4615_v27  ;;  %v4594_v27 = vcombine.low %v1575_v22, %v1579_v23  ;;  %v4603_v29 = vcombine.high %v1583_v25, %v1587_v26  ;;  %v4602_v31 = vcombine.low %v1583_v25, %v1587_v26  ;;  %v5322_v22 = vld [vmem:[#allocation11 + $0xc0] sm:$0xff]   ;;  %v1647_v23 = vld [vmem:[#allocation8 + $0x298] sm:$0xff] }
 0x3d6   : > { %v1655_v26 = vld [vmem:[#allocation8 + $0x2d8] sm:$0xff] }
 0x3d8   : > { %3324 = vmatpush1.bf16.msra.mxu0 %v4614_v32  ;;  %v4611_v32 = vcombine.high %v1591_v35, %v1595_v30  ;;  %v1663_v30 = vld [vmem:[#allocation8 + $0x318] sm:$0xff] }
 0x3d9   : > { %3325 = vmatprep.subr.bf16.mxu0 %v4623_v34  ;;  %v1599_v34 = vld [vmem:[#allocation8 + $0x118] sm:$0xff] }
 0x3da   : > { %v4619_v44 = vcombine.high %v1599_v34, %v1603_v58 }
 0x3dc   : > { %3326 = vmatpush1.bf16.msra.mxu0 %v4622_v46  ;;  %v1611_v46 = vld [vmem:[#allocation8 + $0x178] sm:$0xff] }
 0x3dd   : > { %3327 = vmatprep.subr.bf16.mxu0 %v4631_v49  ;;  %v3464_v49 = vsub.s32 4, %v6015_v45 }
 0x3df   : > { %v3465_v55 = vrot.slane %v6059_v50, %v3464_v49  ;;  %v1683_v49 = vld [vmem:[#allocation8 + $0x3b8] sm:$0xff] }
 0x3e0   : > { %3328 = vmatpush1.bf16.msra.mxu0 %v4630_v1  ;;  %v4627_v1 = vcombine.high %v1607_v33, %v1611_v46 }
 0x3e1   : > { %3329 = vmatprep.subr.bf16.mxu0 %v4639_v52  ;;  %v1615_v52 = vld [vmem:[#allocation8 + $0x198] sm:$0xff] }
 0x3e2   : > { %v4635_v47 = vcombine.high %v1615_v52, %v1619_v42 }
 0x3e4   : > { %3330 = vmatpush1.bf16.msra.mxu0 %v4638_v57  ;;  %v3469_v57 = vrot.slane %v6059_v50, %v3468_v51 }
 0x3e5   : > { %3331 = vmatprep.subr.bf16.mxu0 %v4647_v18  ;;  %v4626_v18 = vcombine.low %v1607_v33, %v1611_v46  ;;  %v1679_v46 = vld [vmem:[#allocation8 + $0x398] sm:$0xff] }
 0x3e6   : > { %v4699_v51 = vcombine.high %v1679_v46, %v1683_v49 }
 0x3e8   : > { %3332 = vmatpush1.bf16.msra.mxu0 %v4646_v48 }
 0x3e9   : > { %3333 = vmatprep.subr.bf16.mxu0 %v4655_v6  ;;  %v1623_v6 = vld [vmem:[#allocation8 + $0x1d8] sm:$0xff] }
 0x3ec   : > { %3334 = vmatpush1.bf16.msra.mxu0 %v4654_v62 }
 0x3ed   : > { %3335 = vmatprep.subr.bf16.mxu0 %v4663_v0  ;;  %v5318_v0 = vld [vmem:[#allocation11 + $0x70] sm:$0xff]  }
 0x3ee   : > { %4900 = vmatprep.subr.bf16.mxu1 %v5318_v0 }
 0x3f0   : > { %3336 = vmatpush1.bf16.msra.mxu0 %v4662_v4  ;;  %v4634_v4 = vcombine.low %v1615_v52, %v1619_v42  ;;  %v1691_v52 = vld [vmem:[#allocation8 + $0x3f8] sm:$0xff]  ;;  %v4698_v42 = vcombine.low %v1679_v46, %v1683_v49  ;;  %v5340_v46 = vld [vmem:[#allocation11 + $0x148] sm:$0xff]  }
 0x3f1   : > { %3337 = vmatprep.subr.bf16.mxu0 %v4671_v7  ;;  %v5319_v7 = vld [vmem:[#allocation11 + $0x30] sm:$0xff]   ;;  %v5341_v49 = vld [vmem:[#allocation11 + $0x108] sm:$0xff]  }
 0x3f2   : > { %4901 = vmatpush3.bf16.msra.mxu1 %v5319_v7 }
 0x3f3   : > { %4902 = vmatprep.subr.bf16.mxu1 %v5320_v9  ;;  %v5331_v9 = vld [vmem:[#allocation11 + $0xa0] sm:$0xff]  }
 0x3f4   : > { %3338 = vmatpush1.bf16.msra.mxu0 %v4670_v36  ;;  %v4643_v36 = vcombine.high %v1623_v6, %v1627_v19 }
 0x3f5   : > { %3339 = vmatprep.subr.bf16.mxu0 %v4679_v37 }
 0x3f6   : > { %4903 = vmatpush3.bf16.msra.mxu1 %v5321_v59  ;;  %v5335_v59 = vld [vmem:[#allocation11 + $0xb0] sm:$0xff]  }
 0x3f7   : > { %4910 = vmatprep.subr.bf16.mxu1 %v5322_v22 }
 0x3f8   : > { %3340 = vmatpush1.bf16.msra.mxu0 %v4678_v40 }
 0x3f9   : > { %3341 = vmatprep.subr.bf16.mxu0 %v4687_v41 }
 0x3fc   : > { %3342 = vmatpush1.bf16.msra.mxu0 %v4686_v11 }
 0x3fd   : > { %3343 = vmatprep.subr.bf16.mxu0 %v4695_v12  ;;  %v4642_v12 = vcombine.low %v1623_v6, %v1627_v19 }
 0x400   : > { %3344 = vmatpush1.bf16.msra.mxu0 %v4694_v15  ;;  %v4651_v15 = vcombine.high %v1631_v43, %v1635_v39 }
 0x401   : > { %3345 = vmatprep.subr.bf16.mxu0 %v4703_v17 }
 0x404   : > { %3346 = vmatpush1.bf16.msra.mxu0 %v4702_v5  ;;  %v4650_v5 = vcombine.low %v1631_v43, %v1635_v39  ;;  %v5327_v43 = vld [vmem:[#allocation11 + $0x90] sm:$0xff]   ;;  %v5328_v39 = vld [vmem:[#allocation11 + $0xd8] sm:$0xff]  }
 0x405   : > { %3401 = vmatprep.subr.bf16.mxu0 %v4587_v21  ;;  %v4659_v21 = vcombine.high %v1639_v54, %v1643_v56 }
 0x407   : > { %3348 = vmatmul.mubr.bf16.vlgmr.msra.gmra.mrb[36].mxu0 %v6026_v16 }
 0x408   : > { %3402 = vmatpush1.bf16.msra.mxu0 %v4586_v53  ;;  %3433 = vmatprep.mubr.bf16.mxu0 %v6028_v20  ;;  %v4618_v20 = vcombine.low %v1599_v34, %v1603_v58  ;;  %v1651_v53 = vld [vmem:[#allocation8 + $0x2b8] sm:$0xff] }
 0x409   : > { %3403 = vmatprep.subr.bf16.mxu0 %v4595_v24  ;;  %v4658_v24 = vcombine.low %v1639_v54, %v1643_v56  ;;  %v4667_v25 = vcombine.high %v1647_v23, %v1651_v53  ;;  %v1671_v58 = vld [vmem:[#allocation8 + $0x358] sm:$0xff]  ;;  %v5338_v56 = vld [vmem:[#allocation11 + $0x140] sm:$0xff]  }
 0x40a   : > { %v5337_v54 = vld [vmem:[#allocation11 + $0xb8] sm:$0xff]  }
 0x40c   : > { %3404 = vmatpush1.bf16.msra.mxu0 %v4594_v27  ;;  %v1659_v27 = vld [vmem:[#allocation8 + $0x2f8] sm:$0xff] }
 0x40d   : > { %3405 = vmatprep.subr.bf16.mxu0 %v4603_v29  ;;  %v4666_v29 = vcombine.low %v1647_v23, %v1651_v53  ;;  %v4675_v35 = vcombine.high %v1655_v26, %v1659_v27 }
 0x410   : > { %3406 = vmatpush1.bf16.msra.mxu0 %v4602_v31  ;;  %v1667_v31 = vld [vmem:[#allocation8 + $0x338] sm:$0xff] }
 0x411   : > { %3407 = vmatprep.subr.bf16.mxu0 %v4611_v32  ;;  %v4674_v32 = vcombine.low %v1655_v26, %v1659_v27  ;;  %v4683_v34 = vcombine.high %v1663_v30, %v1667_v31 }
 0x414   : > { %3408 = vmatpush1.bf16.msra.mxu0 %v4610_v28  ;;  %v1675_v28 = vld [vmem:[#allocation8 + $0x378] sm:$0xff] }
 0x415   : > { %3409 = vmatprep.subr.bf16.mxu0 %v4619_v44  ;;  %v4682_v44 = vcombine.low %v1663_v30, %v1667_v31  ;;  %v4691_v33 = vcombine.high %v1671_v58, %v1675_v28 }
 0x418   : > { %3410 = vmatpush1.bf16.msra.mxu0 %v4618_v20  ;;  %v4690_v20 = vcombine.low %v1671_v58, %v1675_v28 }
 0x419   : > { %3411 = vmatprep.subr.bf16.mxu0 %v4627_v1  ;;  %v1687_v1 = vld [vmem:[#allocation8 + $0x3d8] sm:$0xff] }
 0x41a   : > { %v3392_v48 = vpop.f32.mrb[56].mxu1 }
 0x41b   : > { %v3490_v61 = vadd.f32 %v3465_v55, %v3392_v48  ;;  %v3394_v62 = vpop.f32.mrb[57].mxu1 }
 0x41c   : > { %v3491_v2 = vadd.f32 %v3469_v57, %v3394_v62  ;;  %v3396_v3 = vpop.f32.mrb[58].mxu1  ;;  %3412 = vmatpush1.bf16.msra.mxu0 %v4626_v18  ;;  %v3449_v18 = vrot.slane %v6059_v50, %v1142_v38  ;;  %v5324_v38 = vld [vmem:[#allocation11 + $0xc8] sm:$0xff]  }
 0x41d   : > { %v3498_v8 = vadd.f32 %v3465_v55, %v3396_v3  ;;  %v3398_v63 = vpop.f32.mrb[59].mxu1  ;;  %3413 = vmatprep.subr.bf16.mxu0 %v4635_v47  ;;  %v3506_v40 = vmax.f32 %v3490_v61, 0.0  ;;  %v4707_v55 = vcombine.high %v1687_v1, %v1691_v52 }
 0x41e   : > { %v3499_v37 = vadd.f32 %v3469_v57, %v3398_v63  ;;  %v3507_v10 = vmax.f32 %v3491_v2, 0.0  ;;  %v4706_v57 = vcombine.low %v1687_v1, %v1691_v52  ;;  %v5344_v1 = vld [vmem:[#allocation11 + $0x158] sm:$0xff]  }
 0x41f   : > { %v3514_v41 = vmax.f32 %v3498_v8, 0.0  ;;  %v5345_v52 = vld [vmem:[#allocation11 + $0x118] sm:$0xff]  }
 0x420   : > { %v3515_v11 = vmax.f32 %v3499_v37, 0.0  ;;  %3414 = vmatpush1.bf16.msra.mxu0 %v4634_v4  ;;  %v5326_v37 = vld [vmem:[#allocation11 + $0xd0] sm:$0xff]  }
 0x421   : > { %v6064_v14 = vpack.c.bf16 %v3514_v41, %v3506_v40  ;;  %3415 = vmatprep.subr.bf16.mxu0 %v4643_v36  ;;  %v5323_v36 = vld [vmem:[#allocation11 + $0x80] sm:$0xff]   ;;  %v5329_v40 = vld [vmem:[#allocation11 + $0x98] sm:$0xff]  }
 0x422   : > { %v6066_v17 = vpack.c.bf16 %v3515_v11, %v3507_v10  ;;  %v5330_v41 = vld [vmem:[#allocation11 + $0xe0] sm:$0xff]   ;;  %v5332_v10 = vld [vmem:[#allocation11 + $0xe8] sm:$0xff]  }
 0x423   : > { %v5333_v11 = vld [vmem:[#allocation11 + $0xa8] sm:$0xff]  }
 0x424   : > { %3416 = vmatpush1.bf16.msra.mxu0 %v4642_v12  ;;  %v5334_v12 = vld [vmem:[#allocation11 + $0xf0] sm:$0xff]  }
 0x425   : > { %3417 = vmatprep.subr.bf16.mxu0 %v4651_v15  ;;  %v5336_v15 = vld [vmem:[#allocation11 + $0xf8] sm:$0xff]  }
 0x428   : > { %3418 = vmatpush1.bf16.msra.mxu0 %v4650_v5  ;;  %v3456_v5 = vsub.s32 2, %v6015_v45 }
 0x429   : > { %3419 = vmatprep.subr.bf16.mxu0 %v4659_v21  ;;  %v3460_v21 = vsub.s32 3, %v6015_v45 }
 0x42a   : > { %v3457_v22 = vrot.slane %v6059_v50, %v3456_v5 }
 0x42b   : > { %v3461_v23 = vrot.slane %v6059_v50, %v3460_v21 }
 0x42c   : > { %3420 = vmatpush1.bf16.msra.mxu0 %v4658_v24 }
 0x42d   : > { %3421 = vmatprep.subr.bf16.mxu0 %v4667_v25 }
 0x430   : > { %3422 = vmatpush1.bf16.msra.mxu0 %v4666_v29 }
 0x431   : > { %3423 = vmatprep.subr.bf16.mxu0 %v4675_v35 }
 0x434   : > { %3424 = vmatpush1.bf16.msra.mxu0 %v4674_v32 }
 0x435   : > { %3425 = vmatprep.subr.bf16.mxu0 %v4683_v34 }
 0x438   : > { %3426 = vmatpush1.bf16.msra.mxu0 %v4682_v44 }
 0x439   : > { %3427 = vmatprep.subr.bf16.mxu0 %v4691_v33  ;;  %v5339_v33 = vld [vmem:[#allocation11 + $0x100] sm:$0xff]  }
 0x43c   : > { %3428 = vmatpush1.bf16.msra.mxu0 %v4690_v20  ;;  %v5342_v20 = vld [vmem:[#allocation11 + $0x150] sm:$0xff]  }
 0x43d   : > { %3429 = vmatprep.subr.bf16.mxu0 %v4699_v51  ;;  %v5343_v51 = vld [vmem:[#allocation11 + $0x110] sm:$0xff]  }
 0x440   : > { %3430 = vmatpush1.bf16.msra.mxu0 %v4698_v42  ;;  %v5346_v42 = vld [vmem:[#allocation11 + $0x160] sm:$0xff]  }
 0x441   : > { %3431 = vmatprep.subr.bf16.mxu0 %v4707_v55  ;;  %v5347_v55 = vld [vmem:[#allocation11 + $0x120] sm:$0xff]  }
 0x444   : > { %3432 = vmatpush1.bf16.msra.mxu0 %v4706_v57  ;;  %v5348_v57 = vld [vmem:[#allocation11 + $0x168] sm:$0xff]  }
 0x447   : > { %3434 = vmatmul.mubr.bf16.vlgmr.msra.gmra.mrb[40].mxu0 %v6026_v16 }
 0x49a   : > { %v3306_v47 = vpop.f32.mrb[32].mxu0 }
 0x49b   : > { %v3486_v48 = vadd.f32 %v3449_v18, %v3306_v47  ;;  %v3308_v6 = vpop.f32.mrb[33].mxu0  ;;  %v5352_v47 = vld [vmem:[#allocation11 + $0x178] sm:$0xff]  }
 0x49c   : > { %v3487_v19 = vadd.f32 %v3453_v60, %v3308_v6  ;;  %v3310_v61 = vpop.f32.mrb[34].mxu0  ;;  %v5354_v6 = vld [vmem:[#allocation11 + $0x1c0] sm:$0xff]  }
 0x49d   : > { %v3494_v62 = vadd.f32 %v3449_v18, %v3310_v61  ;;  %v3312_v0 = vpop.f32.mrb[35].mxu0  ;;  %v3502_v3 = vmax.f32 %v3486_v48, 0.0  ;;  %v5349_v18 = vld [vmem:[#allocation11 + $0x128] sm:$0xff]   ;;  %v5353_v48 = vld [vmem:[#allocation11 + $0x138] sm:$0xff]  }
 0x49e   : > { %v3495_v2 = vadd.f32 %v3453_v60, %v3312_v0  ;;  %v3503_v7 = vmax.f32 %v3487_v19, 0.0  ;;  %v5350_v60 = vld [vmem:[#allocation11 + $0x170] sm:$0xff]   ;;  %v5355_v19 = vld [vmem:[#allocation11 + $0x180] sm:$0xff]   ;;  %v5356_v61 = vld [vmem:[#allocation11 + $0x1c8] sm:$0xff]  }
 0x49f   : > { %v3510_v4 = vmax.f32 %v3494_v62, 0.0  ;;  %v5357_v62 = vld [vmem:[#allocation11 + $0x188] sm:$0xff]   ;;  %v5358_v0 = vld [vmem:[#allocation11 + $0x1d0] sm:$0xff]  }
 0x4a0   : > { %v3511_v16 = vmax.f32 %v3495_v2, 0.0  ;;  %v5359_v2 = vld [vmem:[#allocation11 + $0x190] sm:$0xff]  }
 0x4a1   : > { %v3518_v8 = vpack.c.bf16 %v3510_v4, %v3502_v3  ;;  %v5360_v3 = vld [vmem:[#allocation11 + $0x1d8] sm:$0xff]  }
 0x4a2   : > { %v3519_v63 = vpack.c.bf16 %v3511_v16, %v3503_v7  ;;  %v5361_v4 = vld [vmem:[#allocation11 + $0x198] sm:$0xff]   ;;  %v5362_v7 = vld [vmem:[#allocation11 + $0x1e0] sm:$0xff]  }
 0x4a3   : > { %v5363_v16 = vld [vmem:[#allocation11 + $0x1a0] sm:$0xff]  }
 0x4a4   : > { %4077 = vmatprep.mubr.bf16.mxu1 %v3519_v63  ;;  %v3472_v63 = vsub.s32 6, %v6015_v45 }
 0x4a5   : > { %4078 = vmatmul.mubr.bf16.vlgmr.msra.gmra.mrb[60].mxu1 %v3518_v8  ;;  %v5364_v8 = vld [vmem:[#allocation11 + $0x1e8] sm:$0xff]  }
 0x4a6   : > { %4911 = vmatpush3.bf16.msra.mxu1 %v5323_v36  ;;  %v5365_v36 = vld [vmem:[#allocation11 + $0x1a8] sm:$0xff]  }
 0x4a7   : > { %4912 = vmatprep.subr.bf16.mxu1 %v5324_v38  ;;  %v3473_v38 = vrot.slane %v6059_v50, %v3472_v63 }
 0x4aa   : > { %4913 = vmatpush3.bf16.msra.mxu1 %v5325_v13  ;;  %v5366_v13 = vld [vmem:[#allocation11 + $0x1f0] sm:$0xff]  }
 0x4ab   : > { %4914 = vmatprep.subr.bf16.mxu1 %v5326_v37 }
 0x4ae   : > { %4915 = vmatpush3.bf16.msra.mxu1 %v5327_v43 }
 0x4af   : > { %4916 = vmatprep.subr.bf16.mxu1 %v5328_v39  ;;  %v5367_v39 = vld [vmem:[#allocation11 + $0x1b0] sm:$0xff]  }
 0x4b2   : > { %4917 = vmatpush3.bf16.msra.mxu1 %v5329_v40 }
 0x4b3   : > { %4918 = vmatprep.subr.bf16.mxu1 %v5330_v41 }
 0x4b6   : > { %4919 = vmatpush3.bf16.msra.mxu1 %v5331_v9  ;;  %v5368_v9 = vld [vmem:[#allocation11 + $0x1f8] sm:$0xff]  }
 0x4b7   : > { %4920 = vmatprep.subr.bf16.mxu1 %v5332_v10 }
 0x4ba   : > { %4921 = vmatpush3.bf16.msra.mxu1 %v5333_v11 }
 0x4bb   : > { %4922 = vmatprep.subr.bf16.mxu1 %v5334_v12 }
 0x4be   : > { %4923 = vmatpush3.bf16.msra.mxu1 %v5335_v59 }
 0x4bf   : > { %4924 = vmatprep.subr.bf16.mxu1 %v5336_v15  ;;  %v5369_v15 = vld [vmem:[#allocation11 + $0x1b8] sm:$0xff]  }
 0x4c2   : > { %4925 = vmatpush3.bf16.msra.mxu1 %v5337_v54 }
 0x4c3   : > { %4932 = vmatprep.subr.bf16.mxu1 %v5338_v56 }
 0x4da   : > { %v3349_v53 = vpop.f32.mrb[36].mxu0 }
 0x4db   : > { %v3488_v24 = vadd.f32 %v3457_v22, %v3349_v53  ;;  %v3351_v25 = vpop.f32.mrb[37].mxu0 }
 0x4dc   : > { %v3489_v26 = vadd.f32 %v3461_v23, %v3351_v25  ;;  %v3353_v27 = vpop.f32.mrb[38].mxu0 }
 0x4dd   : > { %v3496_v29 = vadd.f32 %v3457_v22, %v3353_v27  ;;  %v3355_v35 = vpop.f32.mrb[39].mxu0  ;;  %v3504_v31 = vmax.f32 %v3488_v24, 0.0 }
 0x4de   : > { %v3497_v30 = vadd.f32 %v3461_v23, %v3355_v35  ;;  %v3505_v34 = vmax.f32 %v3489_v26, 0.0 }
 0x4df   : > { %v3512_v32 = vmax.f32 %v3496_v29, 0.0  ;;  %v4708_v29 = vld [vmem:[%s6194_s19] ss:$0 sm:$0xff] }
 0x4e0   : > { %v3513_v58 = vmax.f32 %v3497_v30, 0.0 }
 0x4e1   : > { %v3520_v28 = vpack.c.bf16 %v3512_v32, %v3504_v31 }
 0x4e2   : > { %v3521_v44 = vpack.c.bf16 %v3513_v58, %v3505_v34 }
 0x4e4   : > { %4118 = vmatprep.mubr.bf16.mxu1 %v3521_v44 }
 0x4e5   : > { %4119 = vmatmul.mubr.bf16.vlgmr.msra.gmra.mrb[64].mxu1 %v3520_v28 }
 0x4e6   : > { %4933 = vmatpush3.bf16.msra.mxu1 %v5339_v33  ;;  %4159 = vmatprep.mubr.bf16.mxu1 %v6066_v17  ;;  %v5351_v17 = vld [vmem:[#allocation11 + $0x130] sm:$0xff]  }
 0x4e7   : > { %4934 = vmatprep.subr.bf16.mxu1 %v5340_v46 }
 0x4ea   : > { %4935 = vmatpush3.bf16.msra.mxu1 %v5341_v49 }
 0x4eb   : > { %4936 = vmatprep.subr.bf16.mxu1 %v5342_v20 }
 0x4ee   : > { %4937 = vmatpush3.bf16.msra.mxu1 %v5343_v51 }
 0x4ef   : > { %4938 = vmatprep.subr.bf16.mxu1 %v5344_v1 }
 0x4f2   : > { %4939 = vmatpush3.bf16.msra.mxu1 %v5345_v52 }
 0x4f3   : > { %4940 = vmatprep.subr.bf16.mxu1 %v5346_v42 }
 0x4f6   : > { %4941 = vmatpush3.bf16.msra.mxu1 %v5347_v55 }
 0x4f7   : > { %4942 = vmatprep.subr.bf16.mxu1 %v5348_v57 }
 0x4fa   : > { %4943 = vmatpush3.bf16.msra.mxu1 %v5349_v18 }
 0x4fb   : > { %4944 = vmatprep.subr.bf16.mxu1 %v5350_v60 }
 0x4fe   : > { %4945 = vmatpush3.bf16.msra.mxu1 %v5351_v17 }
 0x4ff   : > { %4946 = vmatprep.subr.bf16.mxu1 %v5352_v47 }
 0x502   : > { %4947 = vmatpush3.bf16.msra.mxu1 %v5353_v48 }
 0x503   : > { %4954 = vmatprep.subr.bf16.mxu1 %v5354_v6 }
 0x505   : > { %4160 = vmatmul.mubr.bf16.vlgmr.msra.gmra.mrb[68].mxu1 %v6064_v14  ;;  %v3476_v14 = vsub.s32 7, %v6015_v45 }
 0x506   : > { %4955 = vmatpush3.bf16.msra.mxu1 %v5355_v19 }
 0x507   : > { %4956 = vmatprep.subr.bf16.mxu1 %v5356_v61  ;;  %v3477_v37 = vrot.slane %v6059_v50, %v3476_v14 }
 0x50a   : > { %4957 = vmatpush3.bf16.msra.mxu1 %v5357_v62 }
 0x50b   : > { %4958 = vmatprep.subr.bf16.mxu1 %v5358_v0 }
 0x50e   : > { %4959 = vmatpush3.bf16.msra.mxu1 %v5359_v2 }
 0x50f   : > { %4960 = vmatprep.subr.bf16.mxu1 %v5360_v3 }
 0x512   : > { %4961 = vmatpush3.bf16.msra.mxu1 %v5361_v4 }
 0x513   : > { %4962 = vmatprep.subr.bf16.mxu1 %v5362_v7 }
 0x516   : > { %4963 = vmatpush3.bf16.msra.mxu1 %v5363_v16 }
 0x517   : > { %4964 = vmatprep.subr.bf16.mxu1 %v5364_v8 }
 0x51a   : > { %v3435_v43 = vpop.f32.mrb[40].mxu0  ;;  %4965 = vmatpush3.bf16.msra.mxu1 %v5365_v36 }
 0x51b   : > { %v3492_v40 = vadd.f32 %v3473_v38, %v3435_v43  ;;  %v3437_v41 = vpop.f32.mrb[41].mxu0  ;;  %4966 = vmatprep.subr.bf16.mxu1 %v5366_v13 }
 0x51c   : > { %v3493_v10 = vadd.f32 %v3477_v37, %v3437_v41  ;;  %v3439_v11 = vpop.f32.mrb[42].mxu0 }
 0x51d   : > { %v3500_v12 = vadd.f32 %v3473_v38, %v3439_v11  ;;  %v3441_v59 = vpop.f32.mrb[43].mxu0  ;;  %v3508_v54 = vmax.f32 %v3492_v40, 0.0 }
 0x51e   : > { %v3501_v45 = vadd.f32 %v3477_v37, %v3441_v59  ;;  %4967 = vmatpush3.bf16.msra.mxu1 %v5367_v39  ;;  %v3509_v5 = vmax.f32 %v3493_v10, 0.0 }
 0x51f   : > { %v3516_v56 = vmax.f32 %v3500_v12, 0.0  ;;  %4968 = vmatprep.subr.bf16.mxu1 %v5368_v9 }
 0x520   : > { %v3517_v21 = vmax.f32 %v3501_v45, 0.0 }
 0x521   : > { %v3524_v50 = vpack.c.bf16 %v3516_v56, %v3508_v54 }
 0x522   : > { %v3525_v22 = vpack.c.bf16 %v3517_v21, %v3509_v5  ;;  %4969 = vmatpush3.bf16.msra.mxu1 %v5369_v15 }
 0x524   : > { %4200 = vmatprep.mubr.bf16.mxu1 %v3525_v22 }
 0x525   : > { %4201 = vmatmul.mubr.bf16.vlgmr.msra.gmra.mrb[72].mxu1 %v3524_v50 }
 0x578   : > { %v4904_v23 = vpop.f32.mrb[60].mxu1 }
 0x579   : > { %v4905_v53 = vpop.f32.mrb[61].mxu1 }
 0x57a   : > { %v4906_v24 = vadd.f32 %v4905_v53, %v4904_v23  ;;  %v4907_v25 = vpop.f32.mrb[62].mxu1 }
 0x57b   : > { %v4908_v26 = vpop.f32.mrb[63].mxu1 }
 0x57c   : > { %v4909_v27 = vadd.f32 %v4908_v26, %v4907_v25  ;;  %v4080_v31 = vadd.f32 %v4906_v24, %v4708_v29 }
 0x57e   : > { %v4083_v28 = vadd.f32 %v4909_v27, %v4708_v29 }
 0x5b8   : > { %v4926_v35 = vpop.f32.mrb[64].mxu1 }
 0x5b9   : > { %v4927_v30 = vpop.f32.mrb[65].mxu1 }
 0x5ba   : > { %v4928_v32 = vadd.f32 %v4927_v30, %v4926_v35  ;;  %v4929_v34 = vpop.f32.mrb[66].mxu1 }
 0x5bb   : > { %v4930_v58 = vpop.f32.mrb[67].mxu1 }
 0x5bc   : > { %v4121_v44 = vadd.f32 %v4928_v32, %v4080_v31  ;;  %v4931_v33 = vadd.f32 %v4930_v58, %v4929_v34 }
 0x5be   : > { %v4124_v46 = vadd.f32 %v4931_v33, %v4083_v28 }
 0x5d8   : > { %v4948_v49 = vpop.f32.mrb[68].mxu1 }
 0x5d9   : > { %v4949_v20 = vpop.f32.mrb[69].mxu1 }
 0x5da   : > { %v4950_v51 = vadd.f32 %v4949_v20, %v4948_v49  ;;  %v4951_v1 = vpop.f32.mrb[70].mxu1 }
 0x5db   : > { %v4952_v52 = vpop.f32.mrb[71].mxu1 }
 0x5dc   : > { %v4162_v42 = vadd.f32 %v4950_v51, %v4121_v44  ;;  %v4953_v55 = vadd.f32 %v4952_v52, %v4951_v1 }
 0x5de   : > { %v4165_v57 = vadd.f32 %v4953_v55, %v4124_v46 }
 0x5f8   : > { %v4970_v18 = vpop.f32.mrb[72].mxu1 }
 0x5f9   : > { %v4971_v60 = vpop.f32.mrb[73].mxu1 }
 0x5fa   : > { %v4972_v17 = vadd.f32 %v4971_v60, %v4970_v18  ;;  %v4973_v47 = vpop.f32.mrb[74].mxu1 }
 0x5fb   : > { %v4974_v48 = vpop.f32.mrb[75].mxu1 }
 0x5fc   : > { %v4203_v6 = vadd.f32 %v4972_v17, %v4162_v42  ;;  %v4975_v19 = vadd.f32 %v4974_v48, %v4973_v47 }
 0x5fe   : > { %4209 = vst [vmem:[%s475_s9] sm:$0xff] %v4203_v6  ;;  %v4206_v61 = vadd.f32 %v4975_v19, %v4165_v57 }
 0x600   : > { %4210 = vst [vmem:[%s475_s9 + $0x8] sm:$0xff] %v4206_v61 }
 0x601   : > { %5523 = shalt.err (!%p5520_p5)
}
 0x602   : > { %s5524_s29 = scalar_lea.hbm %s6095_s1, 256  ;;  %s5528_s26 = scalar_lea.hbm %s6196_s18, 768 }
 0x603   : > { %p5525_p6 = scmp.ne.s32.totalorder %s6095_s1, %s5524_s29  ;;  %p5529_p13 = scmp.lt.u32.totalorder %s6095_s1, %s6196_s18 }
 0x604   : > { %p5530_p0 = scmp.lt.u32.totalorder %s5528_s26, %s5524_s29  ;;  %p5532_p8 = scmp.lt.u32.totalorder %s5524_s29, %s6095_s1 }
 0x605   : > { %p5526_p11 = pnand %p5525_p6, %p6197_p9 }
 0x606   : > { %p5531_p7 = por %p5530_p0, %p5529_p13 }
 0x607   : > { %p5527_p12 = pneg %p5526_p11 }
 0x608   : > { %p5533_p10 = por %p5532_p8, %p5531_p7 }
 0x60a   : > { %p5534_p1 = pnand %p5533_p10, %p5527_p12 }
 0x60c   : > { %5537 = shalt.err (!%p5534_p1)
}
 0x60d   : > { %s5609_s9 = smov 128   ;;  %s5610_s30 = smov 8  }
 0x60e   : > { %5111 = dma.vmem_to_hbm [thread:$0]  (%p6197_p9), %s6090_s22, 256, %s6095_s1, %s4212_s23, %s5609_s9, %s5609_s9, %s5610_s30  }
 0x60f PF: > { %s6198_s25 = sld [smem:[#allocation22_spill]]  ;;  %s6199_s21 = sld [smem:[#allocation26_spill]] }
 0x610   : > { %p5143_p4 = scmp.ge.s32.totalorder %s5588_s16, 2 }
 0x615   : > { %s4240_s24 = sand.u32 1, %s6198_s25   ;;  %p6200_p3 = scmp.ne.s32.totalorder %s6199_s21, 0 }
 0x616   : > { %s4241_s17 = scalar_lea.sflag [#allocation4], %s4240_s24 }
 0x617   : > { %p5130_p2 = pnand %p5143_p4, %p6200_p3 }
 0x619   : > { %5571 = dma.done.wait (!%p5130_p2), %s4241_s17, 256  }
 0x61a   : > { %5573 = vsyncadd (!%p5130_p2), %s4241_s17, 4294967040  ;;  %s6201_s16 = sld [smem:[#allocation23_spill]]  ;;  %s6202_s27 = sld [smem:[#allocation24_spill]] }
 0x61b   : > { %s6203_s13 = smov %s5580_s14  ;;  %s6204_s14 = smov %s5584_s15 }
 0x620   : > { %p26_p5 = scmp.ge.s32.totalorder %s6201_s16, 5   ;;  %s6205_s15 = smov %s6202_s27 }
 0x622   :  { %28 = sbr.rel (!%p26_p5) target bundleno = 12 (0xc), region = 130 }
 0x629   :  { %4246 = vsyncpa [#allocation3], 1 }
 0x62a   :  { %4248 = vsyncpa [#allocation3 + $0x1], 1 }
 0x62b   :  { %4249 = vsyncpa [#allocation6], 1 }
 0x62c   :  { %4250 = vsyncpa [#allocation9], 1 }
 0x62d   :  { %4251 = vsyncpa [#allocation12], 1 }
 0x62e   :  { %4252 = vsyncpa [#allocation4], 1 }
 0x62f   :  { %4254 = vsyncpa [#allocation4 + $0x1], 1 }

</bundles_post_ra>
